<compile_context>
chip_gen: v7x
topology: tpu7x:2x2x1
jax: 0.10.0
libtpu: 0.0.40
codegen_flags: <defaults>
</compile_context>

<pallas_src>
import math
import functools

import jax
import jax.numpy as jnp
from jax.experimental import pallas as pl
from jax.experimental.pallas import tpu as pltpu


def _mha_kernel(num_heads, depth, block_b, seq_len, shared_qkv, *refs):
    S = seq_len
    D = num_heads * depth
    R = block_b * S

    if shared_qkv:
        (x_ref, wq_ref, bq_ref, wk_ref, wv_ref, bv_ref,
         wo_ref, bo_ref, out_ref, slab_ref) = refs
        q_in = k_in = v_in = x_ref
    else:
        (q_in, k_in, v_in, wq_ref, bq_ref, wk_ref, wv_ref, bv_ref,
         wo_ref, bo_ref, out_ref, slab_ref) = refs

    # Flatten (block_b, S, D) -> (block_b*S, D): leading dims collapse only,
    # lane dim untouched -> no relayout; all rows feed one MXU matmul.
    xq = q_in[...].reshape(R, D).astype(jnp.bfloat16)
    if shared_qkv:
        xk = xv = xq                              # one DMA, reused 3x
    else:
        xk = k_in[...].reshape(R, D).astype(jnp.bfloat16)
        xv = v_in[...].reshape(R, D).astype(jnp.bfloat16)

    # QKV projections: bf16 MXU inputs, f32 accumulation, f32 bias add.
    # 1/sqrt(depth) is already folded into wq/bq; bk is dropped (cancels in
    # softmax since no KV cache is emitted).
    q = jnp.dot(xq, wq_ref[...], preferred_element_type=jnp.float32) + bq_ref[...]
    k = jnp.dot(xk, wk_ref[...], preferred_element_type=jnp.float32)
    v = jnp.dot(xv, wv_ref[...], preferred_element_type=jnp.float32) + bv_ref[...]

    q16 = q.astype(jnp.bfloat16)
    k16 = k.astype(jnp.bfloat16)
    v16 = v.astype(jnp.bfloat16)

    # Causal mask built in-kernel: -10000 strictly above the diagonal.
    row = jax.lax.broadcasted_iota(jnp.int32, (S, S), 0)
    col = jax.lax.broadcasted_iota(jnp.int32, (S, S), 1)
    neg_mask = jnp.where(col > row, jnp.float32(-10000.0), jnp.float32(0.0))

    # A(m,k) x B(n,k) -> (m,n): contract last dims, no transposed operand.
    contract_last = (((1,), (1,)), ((), ()))

    # Static unroll is fine at these small block_b / H (see TODO for scaling).
    for b in range(block_b):
        rows = slice(b * S, (b + 1) * S)
        for h in range(num_heads):
            lo = h * depth
            qh = q16[rows, lo:lo + depth]
            kh = k16[rows, lo:lo + depth]
            vh = v16[rows, lo:lo + depth]

            scores = jax.lax.dot_general(
                qh, kh, dimension_numbers=contract_last,
                preferred_element_type=jnp.float32)          # (S, S) f32
            scores = scores + neg_mask

            smax = jnp.max(scores, axis=-1, keepdims=True)
            p = jnp.exp(scores - smax)                        # unnormalized
            denom = jnp.sum(p, axis=-1, keepdims=True)

            o_h = jnp.dot(p.astype(jnp.bfloat16), vh,
                          preferred_element_type=jnp.float32)  # (S, depth)
            # Normalize after the PV matmul: S*depth mults instead of S*S.
            o_h = o_h * pl.reciprocal(denom, approx=True)      # EUP vrcp

            # Pack this head's output into the contiguous (R, D) bf16 slab
            # (masked sub-lane store -> store slot, not VALU).
            slab_ref[b * S:(b + 1) * S, lo:lo + depth] = o_h.astype(jnp.bfloat16)

    # One dense output projection for the whole row slab: M=R, K=D, N=D.
    out = jnp.dot(slab_ref[...], wo_ref[...],
                  preferred_element_type=jnp.float32) + bo_ref[...]
    out_ref[...] = out.reshape(block_b, S, D).astype(out_ref.dtype)


def prepare_params(params, *, num_heads):
    """One-time prep: fold 1/sqrt(depth) into Wq/bq, cast weights to bf16.

    bk is intentionally not emitted: it cancels exactly in softmax while no
    KV cache is produced (see TODO in the header).
    """
    D = params["wq"].shape[0]
    depth = D // num_heads
    scale = jnp.float32(1.0 / math.sqrt(depth))
    return {
        "wq": (params["wq"] * scale).astype(jnp.bfloat16),
        "bq": (params["bq"] * scale).astype(jnp.float32),
        "wk": params["wk"].astype(jnp.bfloat16),
        "wv": params["wv"].astype(jnp.bfloat16),
        "bv": params["bv"].astype(jnp.float32),
        "wo": params["wo"].astype(jnp.bfloat16),
        "bo": params["bo"].astype(jnp.float32),
    }


def _num_tensorcores():
    """Best-effort detection of dual-TensorCore parts (v7x)."""
    try:
        kind = getattr(jax.devices()[0], "device_kind", "") or ""
    except Exception:
        return 1
    return 2 if "v7" in kind.lower() else 1


def _default_block_b(B, S, n_cores):
    """Largest divisor of B that keeps the row slab under a VMEM-friendly cap
    and (only on multi-TensorCore parts) leaves >= n_cores grid steps."""
    max_rows = 1024
    for cand in range(B, 0, -1):
        if B % cand:
            continue
        if cand > 1 and cand * S > max(max_rows, S):
            continue
        if cand > 1 and (B // cand) < n_cores:
            continue
        return cand
    return 1


def multi_head_attention(q, k, v, prepped, *, num_heads, block_b=None):
    """q, k, v: (B, S, D) f32. prepped: output of prepare_params. Returns (B, S, D).

    If q, k, v are the same array (CTRL self-attention), the hidden states are
    DMA'd once and reused for all three projections.
    """
    B, S, D = q.shape
    depth = D // num_heads
    shared = (q is k) and (k is v)

    if block_b is None:
        block_b = _default_block_b(B, S, _num_tensorcores())
    assert B % block_b == 0, "block_b must divide batch size"
    grid = (B // block_b,)
    R = block_b * S

    # Activations go over the wire in bf16 (block covers full S and D, so the
    # bf16 (16, 128) tiling constraint is satisfied); matmul accumulation and
    # all elementwise math stay f32 inside the kernel.
    acts_f32 = (q,) if shared else (q, k, v)
    acts = tuple(a.astype(jnp.bfloat16) for a in acts_f32)

    act_spec = pl.BlockSpec((block_b, S, D), lambda i: (i, 0, 0))

    def wspec(shape):
        # Weights/biases are grid-invariant (constant index_map).
        # TODO(synk): at CTRL scale, single-buffer these (pl.Buffered(1)) to
        #             halve weight VMEM on v7x.
        return pl.BlockSpec(shape, lambda i, _n=len(shape): (0,) * _n)

    in_specs = list((act_spec,) * len(acts)) + [
        wspec((D, D)), wspec((1, D)),        # Wq, bq (scale folded)
        wspec((D, D)),                       # Wk (bk dropped)
        wspec((D, D)), wspec((1, D)),        # Wv, bv
        wspec((D, D)), wspec((1, D)),        # W_out (dense), b_out
    ]

    kernel = functools.partial(_mha_kernel, num_heads, depth, block_b, S, shared)

    return pl.pallas_call(
        kernel,
        out_shape=jax.ShapeDtypeStruct((B, S, D), q.dtype),
        grid_spec=pltpu.PrefetchScalarGridSpec(
            num_scalar_prefetch=0,
            grid=grid,
            in_specs=in_specs,
            out_specs=pl.BlockSpec((block_b, S, D), lambda i: (i, 0, 0)),
            scratch_shapes=[pltpu.VMEM((R, D), jnp.bfloat16)],   # packed heads
        ),
        compiler_params=pltpu.CompilerParams(
            dimension_semantics=("parallel",)),
    )(*acts,
      prepped["wq"], prepped["bq"], prepped["wk"],
      prepped["wv"], prepped["bv"], prepped["wo"], prepped["bo"])


def mha_ref(q_in, k_in, v_in, params, *, num_heads):
    """Pure-JAX f32 reference mirroring the PyTorch MultiHeadAttention.forward."""
    B, S, D = q_in.shape
    depth = D // num_heads

    q = q_in @ params["wq"] + params["bq"]
    k = k_in @ params["wk"] + params["bk"]
    v = v_in @ params["wv"] + params["bv"]

    def split(t):
        return t.reshape(B, S, num_heads, depth).transpose(0, 2, 1, 3)

    q, k, v = split(q), split(k), split(v)
    scores = jnp.einsum("bhqd,bhkd->bhqk", q, k) / math.sqrt(depth)
    mask = jnp.triu(jnp.ones((S, S), jnp.float32), k=1)
    scores = scores + mask * (-10000.0)
    p = jax.nn.softmax(scores, axis=-1)
    o = jnp.einsum("bhqk,bhkd->bhqd", p, v)
    o = o.transpose(0, 2, 1, 3).reshape(B, S, D)
    return o @ params["wo"] + params["bo"]


if __name__ == "__main__":
    B, S, D, H = 2, 16, 128, 4

    key = jax.random.PRNGKey(0)
    ks = jax.random.split(key, 12)

    def nrm(kk, shape, scale=0.02):
        return (scale * jax.random.normal(kk, shape)).astype(jnp.float32)

    # Linear weights stored as (in, out) == PyTorch weight.T
    params = {
        "wq": nrm(ks[0], (D, D)), "bq": nrm(ks[1], (1, D)),
        "wk": nrm(ks[2], (D, D)), "bk": nrm(ks[3], (1, D)),
        "wv": nrm(ks[4], (D, D)), "bv": nrm(ks[5], (1, D)),
        "wo": nrm(ks[6], (D, D)), "bo": nrm(ks[7], (1, D)),
    }
    prepped = prepare_params(params, num_heads=H)

    # --- CTRL case: self-attention (q = k = v = hidden states) ---
    x = jax.random.normal(ks[8], (B, S, D), jnp.float32)
    out_self = multi_head_attention(x, x, x, prepped, num_heads=H)
    out_self = jax.block_until_ready(out_self)
    ref_self = mha_ref(x, x, x, params, num_heads=H)
    assert out_self.shape == (B, S, D)
    err_self = float(jnp.max(jnp.abs(out_self - ref_self)))
    assert jnp.allclose(out_self, ref_self, atol=2e-2, rtol=2e-2), (
        f"self-attn mismatch vs reference, max abs err {err_self}")

    # --- general case: distinct q / k / v tensors ---
    q_in = jax.random.normal(ks[9], (B, S, D), jnp.float32)
    k_in = jax.random.normal(ks[10], (B, S, D), jnp.float32)
    v_in = jax.random.normal(ks[11], (B, S, D), jnp.float32)
    out_x = multi_head_attention(q_in, k_in, v_in, prepped, num_heads=H)
    out_x = jax.block_until_ready(out_x)
    ref_x = mha_ref(q_in, k_in, v_in, params, num_heads=H)
    err_x = float(jnp.max(jnp.abs(out_x - ref_x)))
    assert jnp.allclose(out_x, ref_x, atol=2e-2, rtol=2e-2), (
        f"cross-attn mismatch vs reference, max abs err {err_x}")

    print("KERNEL_OK")
</pallas_src>

<mosaic_0001>
module attributes {stable_mosaic.version = 11 : i64} {
  func.func @_mha_kernel(%arg0: i32, %arg1: memref<2x16x128xbf16, #tpu.memory_space<vmem>>, %arg2: memref<128x128xbf16, #tpu.memory_space<vmem>>, %arg3: memref<1x128xf32, #tpu.memory_space<vmem>>, %arg4: memref<128x128xbf16, #tpu.memory_space<vmem>>, %arg5: memref<128x128xbf16, #tpu.memory_space<vmem>>, %arg6: memref<1x128xf32, #tpu.memory_space<vmem>>, %arg7: memref<128x128xbf16, #tpu.memory_space<vmem>>, %arg8: memref<1x128xf32, #tpu.memory_space<vmem>>, %arg9: memref<2x16x128xf32, #tpu.memory_space<vmem>>, %arg10: memref<32x128xbf16, #tpu.memory_space<vmem>>) attributes {dimension_semantics = [#tpu.dimension_semantics<parallel>], iteration_bounds = array<i64: 1>, scalar_prefetch = 0 : i64, scratch_operands = 1 : i64, tpu.core_type = #tpu.core_type<tc>, window_params = [{transform_indices = @transform_0, window_bounds = array<i64: 2, 16, 128>}, {pipeline_mode = #tpu.pipeline_mode<synchronous>, transform_indices = @transform_1, window_bounds = array<i64: 128, 128>}, {pipeline_mode = #tpu.pipeline_mode<synchronous>, transform_indices = @transform_2, window_bounds = array<i64: 1, 128>}, {pipeline_mode = #tpu.pipeline_mode<synchronous>, transform_indices = @transform_3, window_bounds = array<i64: 128, 128>}, {pipeline_mode = #tpu.pipeline_mode<synchronous>, transform_indices = @transform_4, window_bounds = array<i64: 128, 128>}, {pipeline_mode = #tpu.pipeline_mode<synchronous>, transform_indices = @transform_5, window_bounds = array<i64: 1, 128>}, {pipeline_mode = #tpu.pipeline_mode<synchronous>, transform_indices = @transform_6, window_bounds = array<i64: 128, 128>}, {pipeline_mode = #tpu.pipeline_mode<synchronous>, transform_indices = @transform_7, window_bounds = array<i64: 1, 128>}, {transform_indices = @transform_8, window_bounds = array<i64: 2, 16, 128>}]} {
    %c0 = arith.constant 0 : index
    %c0_0 = arith.constant 0 : index
    %c0_1 = arith.constant 0 : index
    %0 = vector.load %arg1[%c0, %c0_0, %c0_1] : memref<2x16x128xbf16, #tpu.memory_space<vmem>>, vector<2x16x128xbf16>
    %1 = vector.shape_cast %0 : vector<2x16x128xbf16> to vector<32x128xbf16>
    %c0_2 = arith.constant 0 : index
    %c0_3 = arith.constant 0 : index
    %2 = vector.load %arg2[%c0_2, %c0_3] : memref<128x128xbf16, #tpu.memory_space<vmem>>, vector<128x128xbf16>
    %cst = arith.constant dense<0.000000e+00> : vector<32x128xf32>
    %3 = tpu.matmul %1, %2, %cst {dimension_numbers = #tpu.dot_dimension_numbers<[1], [0], [0], [1], [0, 0, 1, 1], [], []>} : vector<32x128xbf16>, vector<128x128xbf16>, vector<32x128xf32> -> vector<32x128xf32>
    %c0_4 = arith.constant 0 : index
    %c0_5 = arith.constant 0 : index
    %4 = vector.load %arg3[%c0_4, %c0_5] : memref<1x128xf32, #tpu.memory_space<vmem>>, vector<1x128xf32>
    %5 = vector.broadcast %4 : vector<1x128xf32> to vector<32x128xf32>
    %6 = arith.addf %3, %5 : vector<32x128xf32>
    %c0_6 = arith.constant 0 : index
    %c0_7 = arith.constant 0 : index
    %7 = vector.load %arg4[%c0_6, %c0_7] : memref<128x128xbf16, #tpu.memory_space<vmem>>, vector<128x128xbf16>
    %cst_8 = arith.constant dense<0.000000e+00> : vector<32x128xf32>
    %8 = tpu.matmul %1, %7, %cst_8 {dimension_numbers = #tpu.dot_dimension_numbers<[1], [0], [0], [1], [0, 0, 1, 1], [], []>} : vector<32x128xbf16>, vector<128x128xbf16>, vector<32x128xf32> -> vector<32x128xf32>
    %c0_9 = arith.constant 0 : index
    %c0_10 = arith.constant 0 : index
    %9 = vector.load %arg5[%c0_9, %c0_10] : memref<128x128xbf16, #tpu.memory_space<vmem>>, vector<128x128xbf16>
    %cst_11 = arith.constant dense<0.000000e+00> : vector<32x128xf32>
    %10 = tpu.matmul %1, %9, %cst_11 {dimension_numbers = #tpu.dot_dimension_numbers<[1], [0], [0], [1], [0, 0, 1, 1], [], []>} : vector<32x128xbf16>, vector<128x128xbf16>, vector<32x128xf32> -> vector<32x128xf32>
    %c0_12 = arith.constant 0 : index
    %c0_13 = arith.constant 0 : index
    %11 = vector.load %arg6[%c0_12, %c0_13] : memref<1x128xf32, #tpu.memory_space<vmem>>, vector<1x128xf32>
    %12 = vector.broadcast %11 : vector<1x128xf32> to vector<32x128xf32>
    %13 = arith.addf %10, %12 : vector<32x128xf32>
    %14 = arith.truncf %6 : vector<32x128xf32> to vector<32x128xbf16>
    %15 = arith.truncf %8 : vector<32x128xf32> to vector<32x128xbf16>
    %16 = arith.truncf %13 : vector<32x128xf32> to vector<32x128xbf16>
    %17 = tpu.iota {dimensions = array<i32: 0>} : vector<16x16xi32>
    %18 = tpu.iota {dimensions = array<i32: 1>} : vector<16x16xi32>
    %19 = arith.cmpi sgt, %18, %17 : vector<16x16xi32>
    %cst_14 = arith.constant -1.000000e+04 : f32
    %cst_15 = arith.constant 0.000000e+00 : f32
    %20 = vector.broadcast %cst_14 : f32 to vector<16x16xf32>
    %21 = vector.broadcast %cst_15 : f32 to vector<16x16xf32>
    %22 = arith.select %19, %20, %21 : vector<16x16xi1>, vector<16x16xf32>
    %23 = vector.extract_strided_slice %14 {offsets = [0, 0], sizes = [16, 32], strides = [1, 1]} : vector<32x128xbf16> to vector<16x32xbf16>
    %24 = vector.extract_strided_slice %15 {offsets = [0, 0], sizes = [16, 32], strides = [1, 1]} : vector<32x128xbf16> to vector<16x32xbf16>
    %25 = vector.extract_strided_slice %16 {offsets = [0, 0], sizes = [16, 32], strides = [1, 1]} : vector<32x128xbf16> to vector<16x32xbf16>
    %cst_16 = arith.constant dense<0.000000e+00> : vector<16x16xf32>
    %26 = tpu.matmul %23, %24, %cst_16 {dimension_numbers = #tpu.dot_dimension_numbers<[1], [1], [0], [0], [0, 0, 1, 0], [], []>} : vector<16x32xbf16>, vector<16x32xbf16>, vector<16x16xf32> -> vector<16x16xf32>
    %27 = arith.addf %26, %22 : vector<16x16xf32>
    %cst_17 = arith.constant dense<0xFF800000> : vector<16xf32>
    %28 = vector.multi_reduction <maximumf>, %27, %cst_17 [1] : vector<16x16xf32> to vector<16xf32>
    %29 = vector.shape_cast %28 : vector<16xf32> to vector<16x1xf32>
    %30 = vector.broadcast %29 : vector<16x1xf32> to vector<16x16xf32>
    %31 = arith.subf %27, %30 : vector<16x16xf32>
    %32 = math.exp %31 : vector<16x16xf32>
    %cst_18 = arith.constant dense<0.000000e+00> : vector<16xf32>
    %33 = vector.multi_reduction <add>, %32, %cst_18 [1] : vector<16x16xf32> to vector<16xf32>
    %34 = vector.shape_cast %33 : vector<16xf32> to vector<16x1xf32>
    %35 = arith.truncf %32 : vector<16x16xf32> to vector<16x16xbf16>
    %cst_19 = arith.constant dense<0.000000e+00> : vector<16x32xf32>
    %36 = tpu.matmul %35, %25, %cst_19 {dimension_numbers = #tpu.dot_dimension_numbers<[1], [0], [0], [1], [0, 0, 1, 1], [], []>} : vector<16x16xbf16>, vector<16x32xbf16>, vector<16x32xf32> -> vector<16x32xf32>
    %37 = tpu.reciprocal %34 {approx = true} : vector<16x1xf32> -> vector<16x1xf32>
    %38 = vector.broadcast %37 : vector<16x1xf32> to vector<16x32xf32>
    %39 = arith.mulf %36, %38 : vector<16x32xf32>
    %40 = arith.truncf %39 : vector<16x32xf32> to vector<16x32xbf16>
    %c0_20 = arith.constant 0 : index
    %c0_21 = arith.constant 0 : index
    %41 = vector.load %arg10[%c0_20, %c0_21] : memref<32x128xbf16, #tpu.memory_space<vmem>>, vector<16x32xbf16>
    tpu.vector_store %arg10[%c0_20, %c0_21], %40 {strides = array<i32>} : memref<32x128xbf16, #tpu.memory_space<vmem>>, vector<16x32xbf16>,
    %42 = vector.extract_strided_slice %14 {offsets = [0, 32], sizes = [16, 32], strides = [1, 1]} : vector<32x128xbf16> to vector<16x32xbf16>
    %43 = vector.extract_strided_slice %15 {offsets = [0, 32], sizes = [16, 32], strides = [1, 1]} : vector<32x128xbf16> to vector<16x32xbf16>
    %44 = vector.extract_strided_slice %16 {offsets = [0, 32], sizes = [16, 32], strides = [1, 1]} : vector<32x128xbf16> to vector<16x32xbf16>
    %cst_22 = arith.constant dense<0.000000e+00> : vector<16x16xf32>
    %45 = tpu.matmul %42, %43, %cst_22 {dimension_numbers = #tpu.dot_dimension_numbers<[1], [1], [0], [0], [0, 0, 1, 0], [], []>} : vector<16x32xbf16>, vector<16x32xbf16>, vector<16x16xf32> -> vector<16x16xf32>
    %46 = arith.addf %45, %22 : vector<16x16xf32>
    %cst_23 = arith.constant dense<0xFF800000> : vector<16xf32>
    %47 = vector.multi_reduction <maximumf>, %46, %cst_23 [1] : vector<16x16xf32> to vector<16xf32>
    %48 = vector.shape_cast %47 : vector<16xf32> to vector<16x1xf32>
    %49 = vector.broadcast %48 : vector<16x1xf32> to vector<16x16xf32>
    %50 = arith.subf %46, %49 : vector<16x16xf32>
    %51 = math.exp %50 : vector<16x16xf32>
    %cst_24 = arith.constant dense<0.000000e+00> : vector<16xf32>
    %52 = vector.multi_reduction <add>, %51, %cst_24 [1] : vector<16x16xf32> to vector<16xf32>
    %53 = vector.shape_cast %52 : vector<16xf32> to vector<16x1xf32>
    %54 = arith.truncf %51 : vector<16x16xf32> to vector<16x16xbf16>
    %cst_25 = arith.constant dense<0.000000e+00> : vector<16x32xf32>
    %55 = tpu.matmul %54, %44, %cst_25 {dimension_numbers = #tpu.dot_dimension_numbers<[1], [0], [0], [1], [0, 0, 1, 1], [], []>} : vector<16x16xbf16>, vector<16x32xbf16>, vector<16x32xf32> -> vector<16x32xf32>
    %56 = tpu.reciprocal %53 {approx = true} : vector<16x1xf32> -> vector<16x1xf32>
    %57 = vector.broadcast %56 : vector<16x1xf32> to vector<16x32xf32>
    %58 = arith.mulf %55, %57 : vector<16x32xf32>
    %59 = arith.truncf %58 : vector<16x32xf32> to vector<16x32xbf16>
    %c0_26 = arith.constant 0 : index
    %c32 = arith.constant 32 : index
    %60 = vector.load %arg10[%c0_26, %c32] : memref<32x128xbf16, #tpu.memory_space<vmem>>, vector<16x32xbf16>
    tpu.vector_store %arg10[%c0_26, %c32], %59 {strides = array<i32>} : memref<32x128xbf16, #tpu.memory_space<vmem>>, vector<16x32xbf16>,
    %61 = vector.extract_strided_slice %14 {offsets = [0, 64], sizes = [16, 32], strides = [1, 1]} : vector<32x128xbf16> to vector<16x32xbf16>
    %62 = vector.extract_strided_slice %15 {offsets = [0, 64], sizes = [16, 32], strides = [1, 1]} : vector<32x128xbf16> to vector<16x32xbf16>
    %63 = vector.extract_strided_slice %16 {offsets = [0, 64], sizes = [16, 32], strides = [1, 1]} : vector<32x128xbf16> to vector<16x32xbf16>
    %cst_27 = arith.constant dense<0.000000e+00> : vector<16x16xf32>
    %64 = tpu.matmul %61, %62, %cst_27 {dimension_numbers = #tpu.dot_dimension_numbers<[1], [1], [0], [0], [0, 0, 1, 0], [], []>} : vector<16x32xbf16>, vector<16x32xbf16>, vector<16x16xf32> -> vector<16x16xf32>
    %65 = arith.addf %64, %22 : vector<16x16xf32>
    %cst_28 = arith.constant dense<0xFF800000> : vector<16xf32>
    %66 = vector.multi_reduction <maximumf>, %65, %cst_28 [1] : vector<16x16xf32> to vector<16xf32>
    %67 = vector.shape_cast %66 : vector<16xf32> to vector<16x1xf32>
    %68 = vector.broadcast %67 : vector<16x1xf32> to vector<16x16xf32>
    %69 = arith.subf %65, %68 : vector<16x16xf32>
    %70 = math.exp %69 : vector<16x16xf32>
    %cst_29 = arith.constant dense<0.000000e+00> : vector<16xf32>
    %71 = vector.multi_reduction <add>, %70, %cst_29 [1] : vector<16x16xf32> to vector<16xf32>
    %72 = vector.shape_cast %71 : vector<16xf32> to vector<16x1xf32>
    %73 = arith.truncf %70 : vector<16x16xf32> to vector<16x16xbf16>
    %cst_30 = arith.constant dense<0.000000e+00> : vector<16x32xf32>
    %74 = tpu.matmul %73, %63, %cst_30 {dimension_numbers = #tpu.dot_dimension_numbers<[1], [0], [0], [1], [0, 0, 1, 1], [], []>} : vector<16x16xbf16>, vector<16x32xbf16>, vector<16x32xf32> -> vector<16x32xf32>
    %75 = tpu.reciprocal %72 {approx = true} : vector<16x1xf32> -> vector<16x1xf32>
    %76 = vector.broadcast %75 : vector<16x1xf32> to vector<16x32xf32>
    %77 = arith.mulf %74, %76 : vector<16x32xf32>
    %78 = arith.truncf %77 : vector<16x32xf32> to vector<16x32xbf16>
    %c0_31 = arith.constant 0 : index
    %c64 = arith.constant 64 : index
    %79 = vector.load %arg10[%c0_31, %c64] : memref<32x128xbf16, #tpu.memory_space<vmem>>, vector<16x32xbf16>
    tpu.vector_store %arg10[%c0_31, %c64], %78 {strides = array<i32>} : memref<32x128xbf16, #tpu.memory_space<vmem>>, vector<16x32xbf16>,
    %80 = vector.extract_strided_slice %14 {offsets = [0, 96], sizes = [16, 32], strides = [1, 1]} : vector<32x128xbf16> to vector<16x32xbf16>
    %81 = vector.extract_strided_slice %15 {offsets = [0, 96], sizes = [16, 32], strides = [1, 1]} : vector<32x128xbf16> to vector<16x32xbf16>
    %82 = vector.extract_strided_slice %16 {offsets = [0, 96], sizes = [16, 32], strides = [1, 1]} : vector<32x128xbf16> to vector<16x32xbf16>
    %cst_32 = arith.constant dense<0.000000e+00> : vector<16x16xf32>
    %83 = tpu.matmul %80, %81, %cst_32 {dimension_numbers = #tpu.dot_dimension_numbers<[1], [1], [0], [0], [0, 0, 1, 0], [], []>} : vector<16x32xbf16>, vector<16x32xbf16>, vector<16x16xf32> -> vector<16x16xf32>
    %84 = arith.addf %83, %22 : vector<16x16xf32>
    %cst_33 = arith.constant dense<0xFF800000> : vector<16xf32>
    %85 = vector.multi_reduction <maximumf>, %84, %cst_33 [1] : vector<16x16xf32> to vector<16xf32>
    %86 = vector.shape_cast %85 : vector<16xf32> to vector<16x1xf32>
    %87 = vector.broadcast %86 : vector<16x1xf32> to vector<16x16xf32>
    %88 = arith.subf %84, %87 : vector<16x16xf32>
    %89 = math.exp %88 : vector<16x16xf32>
    %cst_34 = arith.constant dense<0.000000e+00> : vector<16xf32>
    %90 = vector.multi_reduction <add>, %89, %cst_34 [1] : vector<16x16xf32> to vector<16xf32>
    %91 = vector.shape_cast %90 : vector<16xf32> to vector<16x1xf32>
    %92 = arith.truncf %89 : vector<16x16xf32> to vector<16x16xbf16>
    %cst_35 = arith.constant dense<0.000000e+00> : vector<16x32xf32>
    %93 = tpu.matmul %92, %82, %cst_35 {dimension_numbers = #tpu.dot_dimension_numbers<[1], [0], [0], [1], [0, 0, 1, 1], [], []>} : vector<16x16xbf16>, vector<16x32xbf16>, vector<16x32xf32> -> vector<16x32xf32>
    %94 = tpu.reciprocal %91 {approx = true} : vector<16x1xf32> -> vector<16x1xf32>
    %95 = vector.broadcast %94 : vector<16x1xf32> to vector<16x32xf32>
    %96 = arith.mulf %93, %95 : vector<16x32xf32>
    %97 = arith.truncf %96 : vector<16x32xf32> to vector<16x32xbf16>
    %c0_36 = arith.constant 0 : index
    %c96 = arith.constant 96 : index
    %98 = vector.load %arg10[%c0_36, %c96] : memref<32x128xbf16, #tpu.memory_space<vmem>>, vector<16x32xbf16>
    tpu.vector_store %arg10[%c0_36, %c96], %97 {strides = array<i32>} : memref<32x128xbf16, #tpu.memory_space<vmem>>, vector<16x32xbf16>,
    %99 = vector.extract_strided_slice %14 {offsets = [16, 0], sizes = [16, 32], strides = [1, 1]} : vector<32x128xbf16> to vector<16x32xbf16>
    %100 = vector.extract_strided_slice %15 {offsets = [16, 0], sizes = [16, 32], strides = [1, 1]} : vector<32x128xbf16> to vector<16x32xbf16>
    %101 = vector.extract_strided_slice %16 {offsets = [16, 0], sizes = [16, 32], strides = [1, 1]} : vector<32x128xbf16> to vector<16x32xbf16>
    %cst_37 = arith.constant dense<0.000000e+00> : vector<16x16xf32>
    %102 = tpu.matmul %99, %100, %cst_37 {dimension_numbers = #tpu.dot_dimension_numbers<[1], [1], [0], [0], [0, 0, 1, 0], [], []>} : vector<16x32xbf16>, vector<16x32xbf16>, vector<16x16xf32> -> vector<16x16xf32>
    %103 = arith.addf %102, %22 : vector<16x16xf32>
    %cst_38 = arith.constant dense<0xFF800000> : vector<16xf32>
    %104 = vector.multi_reduction <maximumf>, %103, %cst_38 [1] : vector<16x16xf32> to vector<16xf32>
    %105 = vector.shape_cast %104 : vector<16xf32> to vector<16x1xf32>
    %106 = vector.broadcast %105 : vector<16x1xf32> to vector<16x16xf32>
    %107 = arith.subf %103, %106 : vector<16x16xf32>
    %108 = math.exp %107 : vector<16x16xf32>
    %cst_39 = arith.constant dense<0.000000e+00> : vector<16xf32>
    %109 = vector.multi_reduction <add>, %108, %cst_39 [1] : vector<16x16xf32> to vector<16xf32>
    %110 = vector.shape_cast %109 : vector<16xf32> to vector<16x1xf32>
    %111 = arith.truncf %108 : vector<16x16xf32> to vector<16x16xbf16>
    %cst_40 = arith.constant dense<0.000000e+00> : vector<16x32xf32>
    %112 = tpu.matmul %111, %101, %cst_40 {dimension_numbers = #tpu.dot_dimension_numbers<[1], [0], [0], [1], [0, 0, 1, 1], [], []>} : vector<16x16xbf16>, vector<16x32xbf16>, vector<16x32xf32> -> vector<16x32xf32>
    %113 = tpu.reciprocal %110 {approx = true} : vector<16x1xf32> -> vector<16x1xf32>
    %114 = vector.broadcast %113 : vector<16x1xf32> to vector<16x32xf32>
    %115 = arith.mulf %112, %114 : vector<16x32xf32>
    %116 = arith.truncf %115 : vector<16x32xf32> to vector<16x32xbf16>
    %c16 = arith.constant 16 : index
    %c0_41 = arith.constant 0 : index
    %117 = vector.load %arg10[%c16, %c0_41] : memref<32x128xbf16, #tpu.memory_space<vmem>>, vector<16x32xbf16>
    tpu.vector_store %arg10[%c16, %c0_41], %116 {strides = array<i32>} : memref<32x128xbf16, #tpu.memory_space<vmem>>, vector<16x32xbf16>,
    %118 = vector.extract_strided_slice %14 {offsets = [16, 32], sizes = [16, 32], strides = [1, 1]} : vector<32x128xbf16> to vector<16x32xbf16>
    %119 = vector.extract_strided_slice %15 {offsets = [16, 32], sizes = [16, 32], strides = [1, 1]} : vector<32x128xbf16> to vector<16x32xbf16>
    %120 = vector.extract_strided_slice %16 {offsets = [16, 32], sizes = [16, 32], strides = [1, 1]} : vector<32x128xbf16> to vector<16x32xbf16>
    %cst_42 = arith.constant dense<0.000000e+00> : vector<16x16xf32>
    %121 = tpu.matmul %118, %119, %cst_42 {dimension_numbers = #tpu.dot_dimension_numbers<[1], [1], [0], [0], [0, 0, 1, 0], [], []>} : vector<16x32xbf16>, vector<16x32xbf16>, vector<16x16xf32> -> vector<16x16xf32>
    %122 = arith.addf %121, %22 : vector<16x16xf32>
    %cst_43 = arith.constant dense<0xFF800000> : vector<16xf32>
    %123 = vector.multi_reduction <maximumf>, %122, %cst_43 [1] : vector<16x16xf32> to vector<16xf32>
    %124 = vector.shape_cast %123 : vector<16xf32> to vector<16x1xf32>
    %125 = vector.broadcast %124 : vector<16x1xf32> to vector<16x16xf32>
    %126 = arith.subf %122, %125 : vector<16x16xf32>
    %127 = math.exp %126 : vector<16x16xf32>
    %cst_44 = arith.constant dense<0.000000e+00> : vector<16xf32>
    %128 = vector.multi_reduction <add>, %127, %cst_44 [1] : vector<16x16xf32> to vector<16xf32>
    %129 = vector.shape_cast %128 : vector<16xf32> to vector<16x1xf32>
    %130 = arith.truncf %127 : vector<16x16xf32> to vector<16x16xbf16>
    %cst_45 = arith.constant dense<0.000000e+00> : vector<16x32xf32>
    %131 = tpu.matmul %130, %120, %cst_45 {dimension_numbers = #tpu.dot_dimension_numbers<[1], [0], [0], [1], [0, 0, 1, 1], [], []>} : vector<16x16xbf16>, vector<16x32xbf16>, vector<16x32xf32> -> vector<16x32xf32>
    %132 = tpu.reciprocal %129 {approx = true} : vector<16x1xf32> -> vector<16x1xf32>
    %133 = vector.broadcast %132 : vector<16x1xf32> to vector<16x32xf32>
    %134 = arith.mulf %131, %133 : vector<16x32xf32>
    %135 = arith.truncf %134 : vector<16x32xf32> to vector<16x32xbf16>
    %c16_46 = arith.constant 16 : index
    %c32_47 = arith.constant 32 : index
    %136 = vector.load %arg10[%c16_46, %c32_47] : memref<32x128xbf16, #tpu.memory_space<vmem>>, vector<16x32xbf16>
    tpu.vector_store %arg10[%c16_46, %c32_47], %135 {strides = array<i32>} : memref<32x128xbf16, #tpu.memory_space<vmem>>, vector<16x32xbf16>,
    %137 = vector.extract_strided_slice %14 {offsets = [16, 64], sizes = [16, 32], strides = [1, 1]} : vector<32x128xbf16> to vector<16x32xbf16>
    %138 = vector.extract_strided_slice %15 {offsets = [16, 64], sizes = [16, 32], strides = [1, 1]} : vector<32x128xbf16> to vector<16x32xbf16>
    %139 = vector.extract_strided_slice %16 {offsets = [16, 64], sizes = [16, 32], strides = [1, 1]} : vector<32x128xbf16> to vector<16x32xbf16>
    %cst_48 = arith.constant dense<0.000000e+00> : vector<16x16xf32>
    %140 = tpu.matmul %137, %138, %cst_48 {dimension_numbers = #tpu.dot_dimension_numbers<[1], [1], [0], [0], [0, 0, 1, 0], [], []>} : vector<16x32xbf16>, vector<16x32xbf16>, vector<16x16xf32> -> vector<16x16xf32>
    %141 = arith.addf %140, %22 : vector<16x16xf32>
    %cst_49 = arith.constant dense<0xFF800000> : vector<16xf32>
    %142 = vector.multi_reduction <maximumf>, %141, %cst_49 [1] : vector<16x16xf32> to vector<16xf32>
    %143 = vector.shape_cast %142 : vector<16xf32> to vector<16x1xf32>
    %144 = vector.broadcast %143 : vector<16x1xf32> to vector<16x16xf32>
    %145 = arith.subf %141, %144 : vector<16x16xf32>
    %146 = math.exp %145 : vector<16x16xf32>
    %cst_50 = arith.constant dense<0.000000e+00> : vector<16xf32>
    %147 = vector.multi_reduction <add>, %146, %cst_50 [1] : vector<16x16xf32> to vector<16xf32>
    %148 = vector.shape_cast %147 : vector<16xf32> to vector<16x1xf32>
    %149 = arith.truncf %146 : vector<16x16xf32> to vector<16x16xbf16>
    %cst_51 = arith.constant dense<0.000000e+00> : vector<16x32xf32>
    %150 = tpu.matmul %149, %139, %cst_51 {dimension_numbers = #tpu.dot_dimension_numbers<[1], [0], [0], [1], [0, 0, 1, 1], [], []>} : vector<16x16xbf16>, vector<16x32xbf16>, vector<16x32xf32> -> vector<16x32xf32>
    %151 = tpu.reciprocal %148 {approx = true} : vector<16x1xf32> -> vector<16x1xf32>
    %152 = vector.broadcast %151 : vector<16x1xf32> to vector<16x32xf32>
    %153 = arith.mulf %150, %152 : vector<16x32xf32>
    %154 = arith.truncf %153 : vector<16x32xf32> to vector<16x32xbf16>
    %c16_52 = arith.constant 16 : index
    %c64_53 = arith.constant 64 : index
    %155 = vector.load %arg10[%c16_52, %c64_53] : memref<32x128xbf16, #tpu.memory_space<vmem>>, vector<16x32xbf16>
    tpu.vector_store %arg10[%c16_52, %c64_53], %154 {strides = array<i32>} : memref<32x128xbf16, #tpu.memory_space<vmem>>, vector<16x32xbf16>,
    %156 = vector.extract_strided_slice %14 {offsets = [16, 96], sizes = [16, 32], strides = [1, 1]} : vector<32x128xbf16> to vector<16x32xbf16>
    %157 = vector.extract_strided_slice %15 {offsets = [16, 96], sizes = [16, 32], strides = [1, 1]} : vector<32x128xbf16> to vector<16x32xbf16>
    %158 = vector.extract_strided_slice %16 {offsets = [16, 96], sizes = [16, 32], strides = [1, 1]} : vector<32x128xbf16> to vector<16x32xbf16>
    %cst_54 = arith.constant dense<0.000000e+00> : vector<16x16xf32>
    %159 = tpu.matmul %156, %157, %cst_54 {dimension_numbers = #tpu.dot_dimension_numbers<[1], [1], [0], [0], [0, 0, 1, 0], [], []>} : vector<16x32xbf16>, vector<16x32xbf16>, vector<16x16xf32> -> vector<16x16xf32>
    %160 = arith.addf %159, %22 : vector<16x16xf32>
    %cst_55 = arith.constant dense<0xFF800000> : vector<16xf32>
    %161 = vector.multi_reduction <maximumf>, %160, %cst_55 [1] : vector<16x16xf32> to vector<16xf32>
    %162 = vector.shape_cast %161 : vector<16xf32> to vector<16x1xf32>
    %163 = vector.broadcast %162 : vector<16x1xf32> to vector<16x16xf32>
    %164 = arith.subf %160, %163 : vector<16x16xf32>
    %165 = math.exp %164 : vector<16x16xf32>
    %cst_56 = arith.constant dense<0.000000e+00> : vector<16xf32>
    %166 = vector.multi_reduction <add>, %165, %cst_56 [1] : vector<16x16xf32> to vector<16xf32>
    %167 = vector.shape_cast %166 : vector<16xf32> to vector<16x1xf32>
    %168 = arith.truncf %165 : vector<16x16xf32> to vector<16x16xbf16>
    %cst_57 = arith.constant dense<0.000000e+00> : vector<16x32xf32>
    %169 = tpu.matmul %168, %158, %cst_57 {dimension_numbers = #tpu.dot_dimension_numbers<[1], [0], [0], [1], [0, 0, 1, 1], [], []>} : vector<16x16xbf16>, vector<16x32xbf16>, vector<16x32xf32> -> vector<16x32xf32>
    %170 = tpu.reciprocal %167 {approx = true} : vector<16x1xf32> -> vector<16x1xf32>
    %171 = vector.broadcast %170 : vector<16x1xf32> to vector<16x32xf32>
    %172 = arith.mulf %169, %171 : vector<16x32xf32>
    %173 = arith.truncf %172 : vector<16x32xf32> to vector<16x32xbf16>
    %c16_58 = arith.constant 16 : index
    %c96_59 = arith.constant 96 : index
    %174 = vector.load %arg10[%c16_58, %c96_59] : memref<32x128xbf16, #tpu.memory_space<vmem>>, vector<16x32xbf16>
    tpu.vector_store %arg10[%c16_58, %c96_59], %173 {strides = array<i32>} : memref<32x128xbf16, #tpu.memory_space<vmem>>, vector<16x32xbf16>,
    %c0_60 = arith.constant 0 : index
    %c0_61 = arith.constant 0 : index
    %175 = vector.load %arg10[%c0_60, %c0_61] : memref<32x128xbf16, #tpu.memory_space<vmem>>, vector<32x128xbf16>
    %c0_62 = arith.constant 0 : index
    %c0_63 = arith.constant 0 : index
    %176 = vector.load %arg7[%c0_62, %c0_63] : memref<128x128xbf16, #tpu.memory_space<vmem>>, vector<128x128xbf16>
    %cst_64 = arith.constant dense<0.000000e+00> : vector<32x128xf32>
    %177 = tpu.matmul %175, %176, %cst_64 {dimension_numbers = #tpu.dot_dimension_numbers<[1], [0], [0], [1], [0, 0, 1, 1], [], []>} : vector<32x128xbf16>, vector<128x128xbf16>, vector<32x128xf32> -> vector<32x128xf32>
    %c0_65 = arith.constant 0 : index
    %c0_66 = arith.constant 0 : index
    %178 = vector.load %arg8[%c0_65, %c0_66] : memref<1x128xf32, #tpu.memory_space<vmem>>, vector<1x128xf32>
    %179 = vector.broadcast %178 : vector<1x128xf32> to vector<32x128xf32>
    %180 = arith.addf %177, %179 : vector<32x128xf32>
    %181 = vector.shape_cast %180 : vector<32x128xf32> to vector<2x16x128xf32>
    %c0_67 = arith.constant 0 : index
    %c0_68 = arith.constant 0 : index
    %c0_69 = arith.constant 0 : index
    %182 = vector.load %arg9[%c0_67, %c0_68, %c0_69] : memref<2x16x128xf32, #tpu.memory_space<vmem>>, vector<2x16x128xf32>
    tpu.vector_store %arg9[%c0_67, %c0_68, %c0_69], %181 {strides = array<i32>} : memref<2x16x128xf32, #tpu.memory_space<vmem>>, vector<2x16x128xf32>,
    return
  }
  func.func @transform_0(%arg0: i32) -> (i32, i32, i32) {
    %c0_i32 = arith.constant 0 : i32
    %c0_i32_0 = arith.constant 0 : i32
    %c0_i32_1 = arith.constant 0 : i32
    return %arg0, %c0_i32, %c0_i32_0 : i32, i32, i32
  }
  func.func @transform_1(%arg0: i32) -> (i32, i32) {
    %c0_i32 = arith.constant 0 : i32
    %c0_i32_0 = arith.constant 0 : i32
    %c0_i32_1 = arith.constant 0 : i32
    return %c0_i32, %c0_i32_0 : i32, i32
  }
  func.func @transform_2(%arg0: i32) -> (i32, i32) {
    %c0_i32 = arith.constant 0 : i32
    %c0_i32_0 = arith.constant 0 : i32
    %c0_i32_1 = arith.constant 0 : i32
    return %c0_i32, %c0_i32_0 : i32, i32
  }
  func.func @transform_3(%arg0: i32) -> (i32, i32) {
    %c0_i32 = arith.constant 0 : i32
    %c0_i32_0 = arith.constant 0 : i32
    %c0_i32_1 = arith.constant 0 : i32
    return %c0_i32, %c0_i32_0 : i32, i32
  }
  func.func @transform_4(%arg0: i32) -> (i32, i32) {
    %c0_i32 = arith.constant 0 : i32
    %c0_i32_0 = arith.constant 0 : i32
    %c0_i32_1 = arith.constant 0 : i32
    return %c0_i32, %c0_i32_0 : i32, i32
  }
  func.func @transform_5(%arg0: i32) -> (i32, i32) {
    %c0_i32 = arith.constant 0 : i32
    %c0_i32_0 = arith.constant 0 : i32
    %c0_i32_1 = arith.constant 0 : i32
    return %c0_i32, %c0_i32_0 : i32, i32
  }
  func.func @transform_6(%arg0: i32) -> (i32, i32) {
    %c0_i32 = arith.constant 0 : i32
    %c0_i32_0 = arith.constant 0 : i32
    %c0_i32_1 = arith.constant 0 : i32
    return %c0_i32, %c0_i32_0 : i32, i32
  }
  func.func @transform_7(%arg0: i32) -> (i32, i32) {
    %c0_i32 = arith.constant 0 : i32
    %c0_i32_0 = arith.constant 0 : i32
    %c0_i32_1 = arith.constant 0 : i32
    return %c0_i32, %c0_i32_0 : i32, i32
  }
  func.func @transform_8(%arg0: i32) -> (i32, i32, i32) {
    %c0_i32 = arith.constant 0 : i32
    %c0_i32_0 = arith.constant 0 : i32
    %c0_i32_1 = arith.constant 0 : i32
    return %arg0, %c0_i32, %c0_i32_0 : i32, i32, i32
  }
}

</mosaic_0001>

<bundles_post_ra>
// kernel: tpu_custom_call.1
= control target key start
LH: loop header
LB: loop body
LE: loop exit
PB: predicated region body
PF: predicated region fallthrough
CT: control target
= control target key end

     0   :  { %13 = vsyncpa [#allocation4], 0  ;;  %s2625_s0 = inlined_call_operand.hbm [shape: bf16[2,16,128], index: 0, kind: input, shape index: {}]   ;;  %s2626_s1 = inlined_call_operand.hbm [shape: bf16[128,128], index: 1, kind: input, shape index: {}]   ;;  %s2627_s2 = inlined_call_operand.vmem [shape: f32[1,128], index: 2, kind: input, shape index: {}]   ;;  %s2628_s3 = inlined_call_operand.hbm [shape: bf16[128,128], index: 3, kind: input, shape index: {}]   ;;  %s2629_s4 = inlined_call_operand.hbm [shape: bf16[128,128], index: 4, kind: input, shape index: {}]   ;;  %s2630_s5 = inlined_call_operand.vmem [shape: f32[1,128], index: 5, kind: input, shape index: {}]   ;;  %s2631_s6 = inlined_call_operand.hbm [shape: bf16[128,128], index: 6, kind: input, shape index: {}]   ;;  %s2632_s7 = inlined_call_operand.vmem [shape: f32[1,128], index: 7, kind: input, shape index: {}]   ;;  %s2633_s8 = inlined_call_operand.hbm [shape: f32[2,16,128], index: 8, kind: output, shape index: {}]  }
   0x1   :  { %14 = vsyncpa [#allocation7], 0 }
   0x2   :  { %15 = vsyncpa [#allocation10], 0 }
   0x3   :  { %16 = vsyncpa [#allocation5], 0  ;;  %s2186_s27 = smov [#allocation6]   ;;  %s2187_s29 = smov [#allocation9]  }
   0x4   :  { %s34_s28 = sshll.u32 %s2186_s27, 4  ;;  %s60_s30 = sshll.u32 %s2187_s29, 4  ;;  %s35_s28 = int_to_ptr.vmem [resolvable:$true] %s34_s28  ;;  %s2245_s30 = int_to_ptr.vmem [resolvable:$true] %s60_s30 }
   0x5   :  { %s2046_s11 = scalar_lea.hbm %s2626_s1, 1024 }
   0x6   :  { %p2047_p0 = scmp.ne.s32.totalorder %s2626_s1, %s2046_s11  ;;  %p2050_p1 = scmp.lt.u32.totalorder %s2046_s11, %s2626_s1 }
   0x8   :  { %p2052_p2 = pnand %p2050_p1, %p2047_p0 }
   0xa   :  { %2055 = shalt.err (!%p2052_p2)
}
   0xb   :  { %s2056_s16 = scalar_lea.vmem %s35_s28, 1024  ;;  %p2061_p4 = scmp.lt.s32.totalorder %s35_s28, %s35_s28 }
   0xc   :  { %p2057_p3 = scmp.ne.s32.totalorder %s35_s28, %s2056_s16  ;;  %p2062_p5 = scmp.lt.s32.totalorder %s2056_s16, %s2056_s16 }
   0xe   :  { %p2063_p6 = por %p2062_p5, %p2061_p4 }
  0x10   :  { %p2064_p7 = pnand %p2063_p6, %p2057_p3 }
  0x12   :  { %2067 = shalt.err (!%p2064_p7)
}
  0x13   :  { %s2188_s17 = smov 64   ;;  %s2189_s18 = smov 4  }
  0x14   :  { %40 = dma.hbm_to_vmem [thread:$0]  %s2626_s1, 1024, %s35_s28, [#allocation7], %s2188_s17, %s2188_s17, %s2189_s18  }
  0x15   :  { %s2068_s23 = scalar_lea.hbm %s2629_s4, 1024 }
  0x16   :  { %p2069_p8 = scmp.ne.s32.totalorder %s2629_s4, %s2068_s23  ;;  %p2072_p9 = scmp.lt.u32.totalorder %s2068_s23, %s2629_s4 }
  0x18   :  { %p2074_p10 = pnand %p2072_p9, %p2069_p8 }
  0x1a   :  { %2077 = shalt.err (!%p2074_p10)
}
  0x1b   :  { %s2078_s29 = scalar_lea.vmem %s2245_s30, 1024  ;;  %p2083_p12 = scmp.lt.s32.totalorder %s2245_s30, %s2245_s30 }
  0x1c   :  { %p2079_p11 = scmp.ne.s32.totalorder %s2245_s30, %s2078_s29  ;;  %p2084_p13 = scmp.lt.s32.totalorder %s2078_s29, %s2078_s29 }
  0x1e   :  { %p2085_p0 = por %p2084_p13, %p2083_p12 }
  0x20   :  { %p2086_p1 = pnand %p2085_p0, %p2079_p11 }
  0x22   :  { %2089 = shalt.err (!%p2086_p1)
}
  0x23   :  { %66 = dma.hbm_to_vmem [thread:$0]  %s2629_s4, 1024, %s2245_s30, [#allocation10], %s2188_s17, %s2188_s17, %s2189_s18  }
  0x24   :  { %s2190_s9 = smov [#allocation3]   ;;  %s2191_s11 = smov [#allocation8]  }
  0x25   :  { %s22_s10 = sshll.u32 %s2190_s9, 4  ;;  %s48_s12 = sshll.u32 %s2191_s11, 4  ;;  %s23_s10 = int_to_ptr.vmem [resolvable:$true] %s22_s10  ;;  %s2282_s12 = int_to_ptr.vmem [resolvable:$true] %s48_s12 }
  0x26   :  { %s2090_s15 = scalar_lea.hbm %s2625_s0, 256 }
  0x27   :  { %p2091_p2 = scmp.ne.s32.totalorder %s2625_s0, %s2090_s15  ;;  %p2094_p3 = scmp.lt.u32.totalorder %s2090_s15, %s2625_s0 }
  0x29   :  { %p2096_p4 = pnand %p2094_p3, %p2091_p2 }
  0x2b   :  { %2099 = shalt.err (!%p2096_p4)
}
  0x2c   :  { %s2100_s4 = scalar_lea.vmem %s23_s10, 256  ;;  %p2105_p6 = scmp.lt.s32.totalorder %s23_s10, %s23_s10 }
  0x2d   :  { %p2101_p5 = scmp.ne.s32.totalorder %s23_s10, %s2100_s4  ;;  %p2106_p7 = scmp.lt.s32.totalorder %s2100_s4, %s2100_s4 }
  0x2f   :  { %p2107_p8 = por %p2106_p7, %p2105_p6 }
  0x31   :  { %p2108_p9 = pnand %p2107_p8, %p2101_p5 }
  0x33   :  { %2111 = shalt.err (!%p2108_p9)
}
  0x34   :  { %28 = dma.hbm_to_vmem [thread:$0]  %s2625_s0, 256, %s23_s10, [#allocation4], %s2188_s17, %s2188_s17, %s2189_s18  }
  0x35   :  { %s2112_s25 = scalar_lea.hbm %s2628_s3, 1024 }
  0x36   :  { %p2113_p10 = scmp.ne.s32.totalorder %s2628_s3, %s2112_s25  ;;  %p2116_p11 = scmp.lt.u32.totalorder %s2112_s25, %s2628_s3 }
  0x38   :  { %p2118_p12 = pnand %p2116_p11, %p2113_p10 }
  0x3a   :  { %2121 = shalt.err (!%p2118_p12)
}
  0x3b   :  { %s2122_s28 = scalar_lea.vmem %s2282_s12, 1024  ;;  %p2127_p0 = scmp.lt.s32.totalorder %s2282_s12, %s2282_s12 }
  0x3c   :  { %p2123_p13 = scmp.ne.s32.totalorder %s2282_s12, %s2122_s28  ;;  %p2128_p1 = scmp.lt.s32.totalorder %s2122_s28, %s2122_s28 }
  0x3e   :  { %p2129_p2 = por %p2128_p1, %p2127_p0 }
  0x40   :  { %p2130_p3 = pnand %p2129_p2, %p2123_p13 }
  0x42   :  { %2133 = shalt.err (!%p2130_p3)
}
  0x43   :  { %54 = dma.hbm_to_vmem [thread:$0]  %s2628_s3, 1024, %s2282_s12, [#allocation7], %s2188_s17, %s2188_s17, %s2189_s18  }
  0x44   :  { %s2192_s10 = smov [#allocation11]   ;;  %s2134_s15 = scalar_lea.hbm %s2631_s6, 1024 }
  0x45   :  { %s74_s11 = sshll.u32 %s2192_s10, 4  ;;  %p2135_p4 = scmp.ne.s32.totalorder %s2631_s6, %s2134_s15  ;;  %s75_s11 = int_to_ptr.vmem [resolvable:$true] %s74_s11 }
  0x46   :  { %p2138_p5 = scmp.lt.u32.totalorder %s2134_s15, %s2631_s6 }
  0x48   :  { %p2140_p6 = pnand %p2138_p5, %p2135_p4 }
  0x4a   :  { %2143 = shalt.err (!%p2140_p6)
}
  0x4b   :  { %s2144_s4 = scalar_lea.vmem %s75_s11, 1024  ;;  %p2149_p8 = scmp.lt.s32.totalorder %s75_s11, %s75_s11 }
  0x4c   :  { %p2145_p7 = scmp.ne.s32.totalorder %s75_s11, %s2144_s4  ;;  %p2150_p9 = scmp.lt.s32.totalorder %s2144_s4, %s2144_s4 }
  0x4e   :  { %p2151_p10 = por %p2150_p9, %p2149_p8 }
  0x50   :  { %p2152_p11 = pnand %p2151_p10, %p2145_p7 }
  0x52   :  { %2155 = shalt.err (!%p2152_p11)
}
  0x53   :  { %80 = dma.hbm_to_vmem [thread:$0]  %s2631_s6, 1024, %s75_s11, [#allocation10], %s2188_s17, %s2188_s17, %s2189_s18  }
  0x54   :  { %2178 = dma.done.wait [#allocation4], 256  }
  0x55   :  { %2179 = vsyncadd [#allocation4], 4294967040 }
  0x56   :  { %2180 = dma.done.wait [#allocation7], 2048  }
  0x57   :  { %2181 = vsyncadd [#allocation7], 4294965248 }
  0x58   :  { %2182 = dma.done.wait [#allocation10], 2048  }
  0x59   :  { %2183 = vsyncadd [#allocation10], 4294965248  ;;  %v1948_v0 = vld [vmem:[#allocation8] sm:$0xff]   ;;  %v1950_v2 = vld [vmem:[#allocation8 + $0x8] sm:$0xff]   ;;  %v2193_v26 = vmov 0.0   ;;  %vm2194_vm0 = vmmov 0   ;;  %v474_v57 = vlaneseq }
  0x5a   :  { %v1949_v1 = vld [vmem:[#allocation6] sm:$0xff]   ;;  %1778 = vmatprep.subr.bf16.mxu1 %v1948_v0  ;;  %v1951_v3 = vld [vmem:[#allocation6 + $0x8] sm:$0xff]   ;;  %v1952_v4 = vld [vmem:[#allocation8 + $0x10] sm:$0xff]   ;;  %vm483_vm1 = vcmask 261120   ;;  %vm531_vm4 = vcmask 130048   ;;  %vm730_vm5 = vcmask 523520  }
  0x5b   :  { %1779 = vmatpush3.bf16.msra.mxu1 %v1948_v0  ;;  %1758 = vmatprep.subr.bf16.mxu0 %v1949_v1  ;;  %v1953_v5 = vld [vmem:[#allocation6 + $0x10] sm:$0xff]   ;;  %v1954_v6 = vld [vmem:[#allocation8 + $0x18] sm:$0xff]   ;;  %v1956_v8 = vld [vmem:[#allocation8 + $0x20] sm:$0xff]   ;;  %v475_v58 = vshrl.u32 %v474_v57, 7  ;;  %v478_v59 = vand.u32 127, %v474_v57  ;;  %vm858_vm6 = vcmask 785920  }
  0x5c   :  { %1759 = vmatpush3.bf16.msra.mxu0 %v1949_v1  ;;  %1780 = vmatprep.subr.bf16.mxu1 %v1950_v2  ;;  %v1955_v7 = vld [vmem:[#allocation6 + $0x18] sm:$0xff]   ;;  %v1957_v9 = vld [vmem:[#allocation6 + $0x20] sm:$0xff]   ;;  %v1958_v10 = vld [vmem:[#allocation8 + $0x28] sm:$0xff]   ;;  %vm986_vm7 = vcmask 1048320   ;;  %s2197_s24 = smov [#allocation12]  }
  0x5d   :  { %1760 = vmatprep.subr.bf16.mxu0 %v1951_v3  ;;  %v1964_v11 = vld [vmem:[#allocation3] sm:$0xff]   ;;  %v1959_v12 = vld [vmem:[#allocation6 + $0x28] sm:$0xff]   ;;  %v1962_v15 = vld [vmem:[#allocation8 + $0x38] sm:$0xff]   ;;  %v476_v60 = vadd.s32 8, %v475_v58  ;;  %vm479_vm2 = vcmp.gt.s32.totalorder %v478_v59, %v475_v58  ;;  %s1619_s25 = sshll.u32 %s2197_s24, 4  ;;  %s1620_s25 = int_to_ptr.vmem [resolvable:$true] %s1619_s25 }
  0x5e   :  { %1794 = vmatprep.mubr.bf16.mxu1 %v1964_v11  ;;  %1774 = vmatprep.mubr.bf16.mxu0 %v1964_v11  ;;  %v1960_v13 = vld [vmem:[#allocation8 + $0x30] sm:$0xff]   ;;  %v1963_v16 = vld [vmem:[#allocation6 + $0x38] sm:$0xff]   ;;  %v1966_v17 = vld [vmem:[#allocation9] sm:$0xff]   ;;  %v2379_v61 = vsel %vm479_vm2, -10000.0, %v2193_v26  ;;  %s2156_s26 = scalar_lea.vmem %s1620_s25, 512  ;;  %p2161_p13 = scmp.lt.s32.totalorder %s1620_s25, %s1620_s25 }
  0x5f   :  { %1781 = vmatpush3.bf16.msra.mxu1 %v1950_v2  ;;  %v1961_v14 = vld [vmem:[#allocation6 + $0x30] sm:$0xff]   ;;  %v1965_v18 = vld [vmem:[#allocation3 + $0x8] sm:$0xff]   ;;  %v1967_v19 = vld [vmem:[#allocation9 + $0x8] sm:$0xff]   ;;  %vm480_vm3 = vcmp.gt.s32.totalorder %v478_v59, %v476_v60  ;;  %p2157_p12 = scmp.ne.s32.totalorder %s1620_s25, %s2156_s26  ;;  %p2162_p0 = scmp.lt.s32.totalorder %s2156_s26, %s2156_s26 }
  0x60   :  { %1761 = vmatpush3.bf16.msra.mxu0 %v1951_v3  ;;  %1782 = vmatprep.subr.bf16.mxu1 %v1952_v4  ;;  %v1968_v20 = vld [vmem:[#allocation9 + $0x10] sm:$0xff]   ;;  %v1969_v21 = vld [vmem:[#allocation9 + $0x18] sm:$0xff]   ;;  %v1970_v22 = vld [vmem:[#allocation9 + $0x20] sm:$0xff]   ;;  %v2384_v1 = vsel %vm480_vm3, -10000.0, %v2193_v26 }
  0x61   :  { %1762 = vmatprep.subr.bf16.mxu0 %v1953_v5  ;;  %v1971_v23 = vld [vmem:[#allocation9 + $0x28] sm:$0xff]   ;;  %v1972_v24 = vld [vmem:[#allocation9 + $0x30] sm:$0xff]   ;;  %v1973_v25 = vld [vmem:[#allocation9 + $0x38] sm:$0xff]   ;;  %p2163_p1 = por %p2162_p0, %p2161_p13 }
  0x62   :  { %v1633_v27 = vld [vmem:[%s2627_s2] ss:$0 sm:$0xff]  ;;  %s2195_s2 = smov 96  }
  0x63   :  { %1783 = vmatpush3.bf16.msra.mxu1 %v1952_v4  ;;  %v1652_v46 = vld [vmem:[%s2630_s5] ss:$0 sm:$0xff]  ;;  %s2196_s5 = smov 32   ;;  %p2164_p2 = pnand %p2163_p1, %p2157_p12 }
  0x64   :  { %1763 = vmatpush3.bf16.msra.mxu0 %v1953_v5  ;;  %1784 = vmatprep.subr.bf16.mxu1 %v1954_v6 }
  0x65   :  { %1764 = vmatprep.subr.bf16.mxu0 %v1955_v7 }
  0x67   :  { %1785 = vmatpush3.bf16.msra.mxu1 %v1954_v6 }
  0x68   :  { %1765 = vmatpush3.bf16.msra.mxu0 %v1955_v7  ;;  %1786 = vmatprep.subr.bf16.mxu1 %v1956_v8 }
  0x69   :  { %1766 = vmatprep.subr.bf16.mxu0 %v1957_v9 }
  0x6b   :  { %1787 = vmatpush3.bf16.msra.mxu1 %v1956_v8 }
  0x6c   :  { %1767 = vmatpush3.bf16.msra.mxu0 %v1957_v9  ;;  %1788 = vmatprep.subr.bf16.mxu1 %v1958_v10 }
  0x6d   :  { %1768 = vmatprep.subr.bf16.mxu0 %v1959_v12 }
  0x6f   :  { %1789 = vmatpush3.bf16.msra.mxu1 %v1958_v10 }
  0x70   :  { %1769 = vmatpush3.bf16.msra.mxu0 %v1959_v12  ;;  %1790 = vmatprep.subr.bf16.mxu1 %v1960_v13 }
  0x71   :  { %1770 = vmatprep.subr.bf16.mxu0 %v1961_v14 }
  0x73   :  { %1791 = vmatpush3.bf16.msra.mxu1 %v1960_v13 }
  0x74   :  { %1771 = vmatpush3.bf16.msra.mxu0 %v1961_v14  ;;  %1792 = vmatprep.subr.bf16.mxu1 %v1962_v15 }
  0x75   :  { %1772 = vmatprep.subr.bf16.mxu0 %v1963_v16 }
  0x77   :  { %1793 = vmatpush3.bf16.msra.mxu1 %v1962_v15 }
  0x78   :  { %1773 = vmatpush3.bf16.msra.mxu0 %v1963_v16  ;;  %1818 = vmatprep.subr.bf16.mxu1 %v2193_v26 }
  0x79   :  { %1798 = vmatprep.subr.bf16.mxu0 %v1966_v17 }
  0x7a   :  { %1795 = vmatmul.mubr.bf16.vlgmr.msra.gmra.mrb[0].mxu1 %v1965_v18 }
  0x7b   :  { %1775 = vmatmul.mubr.bf16.vlgmr.msra.gmra.mrb[0].mxu0 %v1965_v18  ;;  %1820 = vmatprep.mubr.msk.bf16.mxu1 %vm2194_vm0, %v2193_v26 }
  0x7c   :  { %1799 = vmatpush3.bf16.msra.mxu0 %v1966_v17  ;;  %1814 = vmatprep.mubr.bf16.mxu0 %v1964_v11 }
  0x7d   :  { %1800 = vmatprep.subr.bf16.mxu0 %v1967_v19 }
  0x80   :  { %1801 = vmatpush3.bf16.msra.mxu0 %v1967_v19 }
  0x81   :  { %1802 = vmatprep.subr.bf16.mxu0 %v1968_v20 }
  0x84   :  { %1803 = vmatpush3.bf16.msra.mxu0 %v1968_v20 }
  0x85   :  { %1804 = vmatprep.subr.bf16.mxu0 %v1969_v21 }
  0x88   :  { %1805 = vmatpush3.bf16.msra.mxu0 %v1969_v21 }
  0x89   :  { %1806 = vmatprep.subr.bf16.mxu0 %v1970_v22 }
  0x8c   :  { %1807 = vmatpush3.bf16.msra.mxu0 %v1970_v22 }
  0x8d   :  { %1808 = vmatprep.subr.bf16.mxu0 %v1971_v23 }
  0x90   :  { %1809 = vmatpush3.bf16.msra.mxu0 %v1971_v23 }
  0x91   :  { %1810 = vmatprep.subr.bf16.mxu0 %v1972_v24 }
  0x94   :  { %1811 = vmatpush3.bf16.msra.mxu0 %v1972_v24 }
  0x95   :  { %1812 = vmatprep.subr.bf16.mxu0 %v1973_v25 }
  0x98   :  { %1813 = vmatpush3.bf16.msra.mxu0 %v1973_v25 }
  0x99   :  { %1866 = vmatprep.subr.bf16.mxu0 %v2193_v26 }
  0x9b   :  { %1815 = vmatmul.mubr.bf16.vlgmr.msra.gmra.mrb[4].mxu0 %v1965_v18 }
  0x9c   :  { %1868 = vmatprep.mubr.msk.bf16.mxu0 %vm2194_vm0, %v2193_v26 }
 0x14d   :  { %v1796_v28 = vpop.f32.mrb[0].mxu1 }
 0x14e   :  { %v333_v29 = vpop.f32.mrb[1].mxu1  ;;  %v1776_v30 = vpop.f32.mrb[0].mxu0 }
 0x14f   :  { %v1797_v31 = vpop.f32.mrb[2].mxu1  ;;  %v229_v32 = vadd.f32 %v1776_v30, %v1633_v27  ;;  %v220_v33 = vpop.f32.mrb[1].mxu0 }
 0x150   :  { %v2343_v34 = vpack.c.bf16 %v1797_v31, %v1796_v28  ;;  %v336_v35 = vpop.f32.mrb[3].mxu1  ;;  %v221_v36 = vadd.f32 %v1633_v27, %v220_v33  ;;  %v1777_v37 = vpop.f32.mrb[2].mxu0 }
 0x151   :  { %v2345_v38 = vpack.c.bf16 %v336_v35, %v333_v29  ;;  %v232_v39 = vadd.f32 %v1777_v37, %v1633_v27  ;;  %v223_v40 = vpop.f32.mrb[3].mxu0 }
 0x152   :  { %v224_v41 = vadd.f32 %v1633_v27, %v223_v40  ;;  %v992_v42 = vsel %vm483_vm1, %v2343_v34, 0 }
 0x153   :  { %v2349_v43 = vpack.c.bf16 %v232_v39, %v229_v32  ;;  %605 = vrot.lane.b32.xlu1 %v2345_v38, %s2195_s2  ;;  %1867 = vmatpush3.bf16.xpose.msra.mxu0 %v992_v42  ;;  %v488_v44 = vsel %vm483_vm1, %v2345_v38, 0 }
 0x154   :  { %v2355_v45 = vpack.c.bf16 %v224_v41, %v221_v36  ;;  %1819 = vmatpush3.bf16.xpose.msra.mxu1 %v488_v44  ;;  %1878 = vmatprep.subr.bf16.mxu0 %v2193_v26 }
 0x155   :  { %1824 = vmatprep.subr.bf16.mxu1 %v2193_v26 }
 0x157   :  { %602 = vrot.lane.b32.xlu1 %v2355_v45, %s2195_s2 }
 0x15a   :  { %1869 = vmatmul.mubr.msk.bf16.vlgmr.msra.gmra.mrb[8].mxu0 %vm483_vm1, %v2349_v43 }
 0x15b   :  { %1821 = vmatmul.mubr.msk.bf16.vlgmr.msra.gmra.mrb[4].mxu1 %vm483_vm1, %v2355_v45  ;;  %1880 = vmatprep.mubr.msk.bf16.mxu0 %vm2194_vm0, %v2193_v26 }
 0x15c   :  { %1826 = vmatprep.mubr.msk.bf16.mxu1 %vm2194_vm0, %v2193_v26 }
 0x16e   :  { %v1816_v47 = vpop.f32.mrb[4].mxu0 }
 0x16f   :  { %v462_v48 = vadd.f32 %v1816_v47, %v1652_v46  ;;  %v453_v49 = vpop.f32.mrb[5].mxu0 }
 0x170   :  { %v454_v50 = vadd.f32 %v1652_v46, %v453_v49  ;;  %v1817_v51 = vpop.f32.mrb[6].mxu0 }
 0x171   :  { %v465_v52 = vadd.f32 %v1817_v51, %v1652_v46  ;;  %v456_v53 = vpop.f32.mrb[7].mxu0 }
 0x172   :  { %v457_v54 = vadd.f32 %v1652_v46, %v456_v53 }
 0x173   :  { %v2372_v55 = vpack.c.bf16 %v465_v52, %v462_v48 }
 0x174   :  { %v2374_v56 = vpack.c.bf16 %v457_v54, %v454_v50 }
 0x176   :  { %1825 = vmatpush3.bf16.msra.mxu1 %v2374_v56 }
 0x177   :  { %1830 = vmatprep.subr.bf16.mxu1 %v2193_v26 }
 0x1c5   :  { %v606_v19 = vpop.permute.xlu1 %605 }
 0x1c6   :  { %v611_v21 = vsel %vm483_vm1, %v606_v19, 0 }
 0x1c9   :  { %v603_v22 = vpop.permute.xlu1 %602 }
 0x22d   :  { %v2381_v62 = vpop.f32.mrb[8].mxu0 }
 0x22e   :  { %v524_v63 = vpop.f32.mrb[4].mxu1  ;;  %v1870_v0 = vpop.f32.mrb[9].mxu0 }
 0x22f   :  { %v525_v2 = vadd.f32 %v524_v63, %v2379_v61  ;;  %v1822_v3 = vpop.f32.mrb[5].mxu1  ;;  %v2387_v4 = vpop.f32.mrb[10].mxu0 }
 0x230   :  { %v527_v5 = vpop.f32.mrb[6].mxu1  ;;  %v1871_v6 = vpop.f32.mrb[11].mxu0 }
 0x231   :  { %v528_v7 = vadd.f32 %v527_v5, %v2384_v1  ;;  %v1823_v8 = vpop.f32.mrb[7].mxu1  ;;  %v532_v9 = vsel %vm531_vm4, %v525_v2, -inf }
 0x232   :  { %533 = vmax.xlane.f32.xlu0 %v532_v9  ;;  %v2470_v8 = vadd.f32 %v2387_v4, %v2384_v1 }
 0x233   :  { %v535_v10 = vsel %vm531_vm4, %v528_v7, -inf }
 0x234   :  { %v1038_v9 = vsel %vm531_vm4, %v2470_v8, -inf }
 0x236   :  { %536 = vmax.xlane.f32.xlu0 %v535_v10 }
 0x2bf   :  { %v534_v11 = vpop.xlane.xlu0 %533 }
 0x2c0   :  { %v538_v12 = vsub.f32 %v525_v2, %v534_v11 }
 0x2c2   :  { %v540_v13 = vmul.f32 1.442695, %v538_v12 }
 0x2c3   :  { %v537_v14 = vpop.xlane.xlu0 %536 }
 0x2c4   :  { %v539_v15 = vsub.f32 %v528_v7, %v537_v14  ;;  %1982 = vpow2.f32 %v540_v13 }
 0x2c6   :  { %v542_v16 = vmul.f32 1.442695, %v539_v15 }
 0x2c8   :  { %1984 = vpow2.f32 %v542_v16 }
 0x2ce   :  { %v2392_v17 = vpop.eup %1982 }
 0x2d2   :  { %v2394_v18 = vpop.eup %1984 }
 0x2d3   :  { %v550_v20 = vpack.c.bf16 %v2394_v18, %v2392_v17 }
 0x2d5   :  { %1827 = vmatmul.mubr.msk.bf16.vlgmr.msra.gmra.mrb[8].mxu1 %vm531_vm4, %v550_v20 }
 0x2d6   :  { %1831 = vmatpush3.bf16.xpose.msra.mxu1 %v611_v21  ;;  %1832 = vmatprep.mubr.msk.bf16.mxu1 %vm2194_vm0, %v2193_v26 }
 0x2d7   :  { %1836 = vmatprep.subr.bf16.mxu1 %v2193_v26 }
 0x2dd   :  { %1833 = vmatmul.mubr.msk.bf16.vlgmr.msra.gmra.mrb[12].mxu1 %vm483_vm1, %v603_v22 }
 0x2de   :  { %1838 = vmatprep.mubr.msk.bf16.mxu1 %vm2194_vm0, %v2193_v26 }
 0x3a8   :  { %v2406_v23 = vpop.f32.mrb[8].mxu1 }
 0x3a9   :  { %v1828_v24 = vpop.f32.mrb[9].mxu1 }
 0x3aa   :  { %v2408_v25 = vpop.f32.mrb[10].mxu1 }
 0x3ab   :  { %v1829_v27 = vpop.f32.mrb[11].mxu1 }
 0x3b0   :  { %v647_v28 = vpop.f32.mrb[12].mxu1 }
 0x3b1   :  { %v648_v29 = vadd.f32 %v647_v28, %v2379_v61  ;;  %v1834_v30 = vpop.f32.mrb[13].mxu1 }
 0x3b2   :  { %v650_v31 = vpop.f32.mrb[14].mxu1 }
 0x3b3   :  { %v651_v32 = vadd.f32 %v650_v31, %v2384_v1  ;;  %v1835_v33 = vpop.f32.mrb[15].mxu1  ;;  %v654_v35 = vsel %vm531_vm4, %v648_v29, -inf }
 0x3b4   :  { %655 = vmax.xlane.f32.xlu0 %v654_v35 }
 0x3b5   :  { %v657_v36 = vsel %vm531_vm4, %v651_v32, -inf }
 0x3b6   :  { %658 = vmax.xlane.f32.xlu1 %v657_v36 }
 0x3c7   :  { %802 = vrot.lane.b32.xlu1 %v2374_v56, %s2188_s17 }
 0x3ca   :  { %674 = vrot.lane.b32.xlu0 %v2374_v56, %s2195_s2 }
 0x3ce   :  { %734 = vrot.lane.b32.xlu0 %v2345_v38, %s2188_s17 }
 0x3d2   :  { %732 = vrot.lane.b32.xlu0 %v2355_v45, %s2188_s17 }
 0x441   :  { %v656_v37 = vpop.xlane.xlu0 %655 }
 0x442   :  { %v660_v39 = vsub.f32 %v648_v29, %v656_v37 }
 0x443   :  { %v659_v40 = vpop.xlane.xlu1 %658 }
 0x444   :  { %v662_v41 = vmul.f32 1.442695, %v660_v39  ;;  %v661_v42 = vsub.f32 %v651_v32, %v659_v40 }
 0x445   :  { %v675_v44 = vpop.permute.xlu0 %674 }
 0x446   :  { %v664_v46 = vmul.f32 1.442695, %v661_v42  ;;  %1837 = vmatpush3.bf16.msra.mxu1 %v675_v44  ;;  %1986 = vpow2.f32 %v662_v41 }
 0x447   :  { %1842 = vmatprep.subr.bf16.mxu1 %v2193_v26  ;;  %v803_v53 = vpop.permute.xlu1 %802 }
 0x448   :  { %1988 = vpow2.f32 %v664_v46 }
 0x449   :  { %v735_v49 = vpop.permute.xlu0 %734 }
 0x44a   :  { %v740_v51 = vsel %vm483_vm1, %v735_v49, 0 }
 0x44d   :  { %v733_v52 = vpop.permute.xlu0 %732 }
 0x450   :  { %v2423_v47 = vpop.eup %1986 }
 0x452   :  { %v2425_v48 = vpop.eup %1988 }
 0x453   :  { %v672_v50 = vpack.c.bf16 %v2425_v48, %v2423_v47 }
 0x455   :  { %1839 = vmatmul.mubr.msk.bf16.vlgmr.msra.gmra.mrb[16].mxu1 %vm531_vm4, %v672_v50 }
 0x456   :  { %1843 = vmatpush3.bf16.xpose.msra.mxu1 %v740_v51  ;;  %1844 = vmatprep.mubr.msk.bf16.mxu1 %vm2194_vm0, %v2193_v26 }
 0x457   :  { %1848 = vmatprep.subr.bf16.mxu1 %v2193_v26 }
 0x45d   :  { %1845 = vmatmul.mubr.msk.bf16.vlgmr.msra.gmra.mrb[20].mxu1 %vm483_vm1, %v733_v52 }
 0x45e   :  { %1849 = vmatpush3.bf16.msra.mxu1 %v803_v53  ;;  %1850 = vmatprep.mubr.msk.bf16.mxu1 %vm2194_vm0, %v2193_v26 }
 0x45f   :  { %1854 = vmatprep.subr.bf16.mxu1 %v2193_v26 }
 0x528   :  { %v2438_v54 = vpop.f32.mrb[16].mxu1 }
 0x529   :  { %v1840_v57 = vpop.f32.mrb[17].mxu1 }
 0x52a   :  { %v2440_v58 = vpop.f32.mrb[18].mxu1 }
 0x52b   :  { %v1841_v59 = vpop.f32.mrb[19].mxu1 }
 0x530   :  { %v776_v60 = vpop.f32.mrb[20].mxu1 }
 0x531   :  { %v777_v63 = vadd.f32 %v776_v60, %v2379_v61  ;;  %v1846_v0 = vpop.f32.mrb[21].mxu1 }
 0x532   :  { %v779_v2 = vpop.f32.mrb[22].mxu1 }
 0x533   :  { %v780_v3 = vadd.f32 %v779_v2, %v2384_v1  ;;  %v1847_v5 = vpop.f32.mrb[23].mxu1  ;;  %v783_v6 = vsel %vm531_vm4, %v777_v63, -inf }
 0x534   :  { %784 = vmax.xlane.f32.xlu0 %v783_v6 }
 0x535   :  { %v786_v7 = vsel %vm531_vm4, %v780_v3, -inf }
 0x536   :  { %787 = vmax.xlane.f32.xlu1 %v786_v7 }
 0x547   :  { %862 = vrot.lane.b32.xlu1 %v2345_v38, %s2196_s5  ;;  %v2464_v38 = vadd.f32 %v2381_v62, %v2379_v61 }
 0x54a   :  { %1108 = vrot.lane.b32.xlu0 %v2343_v34, %s2195_s2 }
 0x54b   :  { %860 = vrot.lane.b32.xlu1 %v2355_v45, %s2196_s5  ;;  %v1035_v45 = vsel %vm531_vm4, %v2464_v38, -inf }
 0x54f   :  { %1105 = vrot.lane.b32.xlu1 %v2349_v43, %s2195_s2 }
 0x553   :  { %1236 = vrot.lane.b32.xlu1 %v2343_v34, %s2188_s17 }
 0x557   :  { %1234 = vrot.lane.b32.xlu1 %v2349_v43, %s2188_s17 }
 0x55b   :  { %1363 = vrot.lane.b32.xlu1 %v2343_v34, %s2196_s5 }
 0x55f   :  { %1361 = vrot.lane.b32.xlu1 %v2349_v43, %s2196_s5 }
 0x569   :  { %1036 = vmax.xlane.f32.xlu0 %v1035_v45 }
 0x583   :  { %1039 = vmax.xlane.f32.xlu1 %v1038_v9 }
 0x5c1   :  { %v785_v34 = vpop.xlane.xlu0 %784 }
 0x5c2   :  { %v789_v10 = vsub.f32 %v777_v63, %v785_v34 }
 0x5c3   :  { %v788_v11 = vpop.xlane.xlu1 %787 }
 0x5c4   :  { %v791_v43 = vmul.f32 1.442695, %v789_v10  ;;  %v790_v12 = vsub.f32 %v780_v3, %v788_v11 }
 0x5c5   :  { %v1109_v13 = vpop.permute.xlu0 %1108 }
 0x5c6   :  { %v793_v62 = vmul.f32 1.442695, %v790_v12  ;;  %v1114_v14 = vsel %vm483_vm1, %v1109_v13, 0  ;;  %1990 = vpow2.f32 %v791_v43 }
 0x5c7   :  { %1879 = vmatpush3.bf16.xpose.msra.mxu0 %v1114_v14  ;;  %v863_v15 = vpop.permute.xlu1 %862 }
 0x5c8   :  { %1992 = vpow2.f32 %v793_v62  ;;  %1890 = vmatprep.subr.bf16.mxu0 %v2193_v26  ;;  %v868_v27 = vsel %vm483_vm1, %v863_v15, 0 }
 0x5cb   :  { %v861_v4 = vpop.permute.xlu1 %860 }
 0x5cf   :  { %v1106_v16 = vpop.permute.xlu1 %1105 }
 0x5d0   :  { %1881 = vmatmul.mubr.msk.bf16.vlgmr.msra.gmra.mrb[12].mxu0 %vm483_vm1, %v1106_v16  ;;  %v2477_v19 = vpop.eup %1990 }
 0x5d1   :  { %1892 = vmatprep.mubr.msk.bf16.mxu0 %vm2194_vm0, %v2193_v26 }
 0x5d2   :  { %v2481_v20 = vpop.eup %1992 }
 0x5d3   :  { %v1237_v21 = vpop.permute.xlu1 %1236  ;;  %v801_v22 = vpack.c.bf16 %v2481_v20, %v2477_v19  ;;  %v798_v15 = vsel %vm531_vm4, %v2481_v20, 0.0 }
 0x5d4   :  { %v1242_v24 = vsel %vm483_vm1, %v1237_v21, 0 }
 0x5d5   :  { %1851 = vmatmul.mubr.msk.bf16.vlgmr.msra.gmra.mrb[24].mxu1 %vm531_vm4, %v801_v22  ;;  %1891 = vmatpush3.bf16.xpose.msra.mxu0 %v1242_v24 }
 0x5d6   :  { %1855 = vmatpush3.bf16.xpose.msra.mxu1 %v868_v27  ;;  %1856 = vmatprep.mubr.msk.bf16.mxu1 %vm2194_vm0, %v2193_v26 }
 0x5d7   :  { %v1235_v28 = vpop.permute.xlu1 %1234  ;;  %1902 = vmatprep.subr.bf16.mxu0 %v2193_v26  ;;  %1860 = vmatprep.subr.bf16.mxu1 %v2193_v26 }
 0x5db   :  { %v1364_v29 = vpop.permute.xlu1 %1363 }
 0x5dc   :  { %v1369_v30 = vsel %vm483_vm1, %v1364_v29, 0  ;;  %1893 = vmatmul.mubr.msk.bf16.vlgmr.msra.gmra.mrb[16].mxu0 %vm483_vm1, %v1235_v28 }
 0x5dd   :  { %1857 = vmatmul.mubr.msk.bf16.vlgmr.msra.gmra.mrb[28].mxu1 %vm483_vm1, %v861_v4  ;;  %1903 = vmatpush3.bf16.xpose.msra.mxu0 %v1369_v30 }
 0x5de   :  { %1904 = vmatprep.mubr.msk.bf16.mxu0 %vm2194_vm0, %v2193_v26  ;;  %1862 = vmatprep.mubr.msk.bf16.mxu1 %vm2194_vm0, %v2193_v26 }
 0x5df   :  { %v1362_v31 = vpop.permute.xlu1 %1361 }
 0x5e4   :  { %1905 = vmatmul.mubr.msk.bf16.vlgmr.msra.gmra.mrb[20].mxu0 %vm483_vm1, %v1362_v31 }
 0x5f6   :  { %v1037_v4 = vpop.xlane.xlu0 %1036 }
 0x610   :  { %v1040_v16 = vpop.xlane.xlu1 %1039 }
 0x6a3   :  { %v1150_v32 = vpop.f32.mrb[12].mxu0 }
 0x6a4   :  { %v1151_v33 = vadd.f32 %v1150_v32, %v2379_v61  ;;  %v1882_v35 = vpop.f32.mrb[13].mxu0 }
 0x6a5   :  { %v1153_v36 = vpop.f32.mrb[14].mxu0 }
 0x6a6   :  { %v1154_v37 = vadd.f32 %v1153_v36, %v2384_v1  ;;  %v1883_v39 = vpop.f32.mrb[15].mxu0  ;;  %v1157_v40 = vsel %vm531_vm4, %v1151_v33, -inf }
 0x6a7   :  { %1158 = vmax.xlane.f32.xlu0 %v1157_v40 }
 0x6a8   :  { %v2503_v41 = vpop.f32.mrb[24].mxu1  ;;  %v1160_v42 = vsel %vm531_vm4, %v1154_v37, -inf }
 0x6a9   :  { %1161 = vmax.xlane.f32.xlu1 %v1160_v42  ;;  %v1852_v44 = vpop.f32.mrb[25].mxu1 }
 0x6aa   :  { %v2506_v46 = vpop.f32.mrb[26].mxu1 }
 0x6ab   :  { %v1853_v49 = vpop.f32.mrb[27].mxu1 }
 0x6af   :  { %v1278_v50 = vpop.f32.mrb[16].mxu0 }
 0x6b0   :  { %v1279_v51 = vadd.f32 %v1278_v50, %v2379_v61  ;;  %v904_v52 = vpop.f32.mrb[28].mxu1  ;;  %v1894_v53 = vpop.f32.mrb[17].mxu0  ;;  %v1042_v50 = vsub.f32 %v2470_v8, %v1040_v16 }
 0x6b1   :  { %v1858_v57 = vpop.f32.mrb[29].mxu1  ;;  %v1281_v59 = vpop.f32.mrb[18].mxu0  ;;  %v905_v6 = vadd.f32 %v904_v52, %v2379_v61  ;;  %v1041_v52 = vsub.f32 %v2464_v38, %v1037_v4 }
 0x6b2   :  { %v1282_v60 = vadd.f32 %v1281_v59, %v2384_v1  ;;  %v907_v63 = vpop.f32.mrb[30].mxu1  ;;  %v1895_v0 = vpop.f32.mrb[19].mxu0  ;;  %v1285_v2 = vsel %vm531_vm4, %v1279_v51, -inf  ;;  %v1045_v59 = vmul.f32 1.442695, %v1042_v50 }
 0x6b3   :  { %v908_v3 = vadd.f32 %v907_v63, %v2384_v1  ;;  %1286 = vmax.xlane.f32.xlu0 %v1285_v2  ;;  %v1859_v5 = vpop.f32.mrb[31].mxu1  ;;  %v911_v11 = vsel %vm531_vm4, %v905_v6, -inf  ;;  %v1043_v63 = vmul.f32 1.442695, %v1041_v52 }
 0x6b4   :  { %v1288_v7 = vsel %vm531_vm4, %v1282_v60, -inf }
 0x6b5   :  { %1289 = vmax.xlane.f32.xlu1 %v1288_v7  ;;  %v914_v45 = vsel %vm531_vm4, %v908_v3, -inf }
 0x6b7   :  { %v1405_v9 = vpop.f32.mrb[20].mxu0  ;;  %915 = vmax.xlane.f32.xlu0 %v914_v45 }
 0x6b8   :  { %v2516_v34 = vadd.f32 %v1405_v9, %v2379_v61  ;;  %v1906_v10 = vpop.f32.mrb[21].mxu0  ;;  %v669_v61 = vsel %vm531_vm4, %v2425_v48, 0.0 }
 0x6b9   :  { %v1408_v43 = vpop.f32.mrb[22].mxu0  ;;  %912 = vmax.xlane.f32.xlu1 %v911_v11 }
 0x6ba   :  { %v1907_v12 = vpop.f32.mrb[23].mxu0  ;;  %v2520_v13 = vadd.f32 %v1408_v43, %v2384_v1  ;;  %v1412_v62 = vsel %vm531_vm4, %v2516_v34, -inf  ;;  %v666_v1 = vsel %vm531_vm4, %v2423_v47, 0.0 }
 0x6bc   :  { %v1415_v14 = vsel %vm531_vm4, %v2520_v13, -inf }
 0x6bd   :  { %1413 = vmax.xlane.f32.xlu1 %v1412_v62 }
 0x6c1   :  { %1416 = vmax.xlane.f32.xlu1 %v1415_v14  ;;  %v544_v14 = vsel %vm531_vm4, %v2392_v17, 0.0 }
 0x6cd   :  { %930 = vrot.lane.b32.xlu0 %v2374_v56, %s2196_s5  ;;  %v795_v56 = vsel %vm531_vm4, %v2477_v19, 0.0 }
 0x6d1   :  { %1304 = vrot.lane.b32.xlu0 %v2372_v55, %s2188_s17 }
 0x6d2   :  { %1177 = vrot.lane.b32.xlu1 %v2372_v55, %s2195_s2 }
 0x6d5   :  { %1431 = vrot.lane.b32.xlu0 %v2372_v55, %s2196_s5 }
 0x6f4   :  { %670 = vadd.xlane.f32.xlu0 %v669_v61 }
 0x6f6   :  { %667 = vadd.xlane.f32.xlu1 %v666_v1 }
 0x6f8   :  { %796 = vadd.xlane.f32.xlu0 %v795_v56 }
 0x6fa   :  { %799 = vadd.xlane.f32.xlu1 %v798_v15  ;;  %v547_v15 = vsel %vm531_vm4, %v2394_v18, 0.0 }
 0x734   :  { %v1159_v21 = vpop.xlane.xlu0 %1158 }
 0x735   :  { %v1163_v22 = vsub.f32 %v1151_v33, %v1159_v21 }
 0x736   :  { %v1162_v24 = vpop.xlane.xlu1 %1161 }
 0x737   :  { %v1165_v27 = vmul.f32 1.442695, %v1163_v22  ;;  %v1164_v48 = vsub.f32 %v1154_v37, %v1162_v24 }
 0x739   :  { %1994 = vpow2.f32 %v1165_v27  ;;  %v1167_v28 = vmul.f32 1.442695, %v1164_v48 }
 0x73b   :  { %1996 = vpow2.f32 %v1167_v28 }
 0x740   :  { %v1287_v47 = vpop.xlane.xlu0 %1286 }
 0x741   :  { %v1291_v29 = vsub.f32 %v1279_v51, %v1287_v47 }
 0x742   :  { %v1290_v30 = vpop.xlane.xlu1 %1289 }
 0x743   :  { %v2542_v31 = vpop.eup %1994  ;;  %v1293_v19 = vmul.f32 1.442695, %v1291_v29  ;;  %v1292_v32 = vsub.f32 %v1282_v60, %v1290_v30 }
 0x744   :  { %v916_v35 = vpop.xlane.xlu0 %915  ;;  %v1169_v20 = vsel %vm531_vm4, %v2542_v31, 0.0 }
 0x745   :  { %v2546_v36 = vpop.eup %1996  ;;  %1998 = vpow2.f32 %v1293_v19  ;;  %v1295_v33 = vmul.f32 1.442695, %v1292_v32  ;;  %v918_v39 = vsub.f32 %v908_v3, %v916_v35  ;;  %1170 = vadd.xlane.f32.xlu0 %v1169_v20 }
 0x746   :  { %v913_v37 = vpop.xlane.xlu1 %912  ;;  %v1172_v40 = vsel %vm531_vm4, %v2546_v36, 0.0  ;;  %v1175_v4 = vpack.c.bf16 %v2546_v36, %v2542_v31 }
 0x747   :  { %2000 = vpow2.f32 %v1295_v33  ;;  %v921_v42 = vmul.f32 1.442695, %v918_v39  ;;  %v917_v44 = vsub.f32 %v905_v6, %v913_v37  ;;  %1173 = vadd.xlane.f32.xlu1 %v1172_v40 }
 0x748   :  { %v931_v49 = vpop.permute.xlu0 %930 }
 0x749   :  { %2002 = vpow2.f32 %v921_v42  ;;  %v919_v51 = vmul.f32 1.442695, %v917_v44  ;;  %1861 = vmatpush3.bf16.msra.mxu1 %v931_v49 }
 0x74a   :  { %v1414_v53 = vpop.xlane.xlu1 %1413  ;;  %1872 = vmatprep.subr.bf16.mxu1 %v2193_v26 }
 0x74b   :  { %2004 = vpow2.f32 %v919_v51  ;;  %v1418_v57 = vsub.f32 %v2516_v34, %v1414_v53 }
 0x74c   :  { %v1305_v16 = vpop.permute.xlu0 %1304 }
 0x74d   :  { %v1420_v60 = vmul.f32 1.442695, %v1418_v57 }
 0x74e   :  { %v1417_v0 = vpop.xlane.xlu1 %1416 }
 0x74f   :  { %v1999_v2 = vpop.eup %1998  ;;  %2006 = vpow2.f32 %v1420_v60  ;;  %v1419_v3 = vsub.f32 %v2520_v13, %v1417_v0  ;;  %v1974_v0 = vld [vmem:[#allocation11] sm:$0xff]  }
 0x750   :  { %v1297_v8 = vsel %vm531_vm4, %v1999_v2, 0.0  ;;  %2008 = vpow2.f32 %v1045_v59  ;;  %v1432_v21 = vpop.permute.xlu0 %1431  ;;  %1914 = vmatprep.subr.bf16.mxu0 %v1974_v0 }
 0x751   :  { %v2001_v5 = vpop.eup %2000  ;;  %v1422_v6 = vmul.f32 1.442695, %v1419_v3  ;;  %1298 = vadd.xlane.f32.xlu0 %v1297_v8  ;;  %2010 = vpow2.f32 %v1043_v63  ;;  %1915 = vmatpush3.bf16.msra.mxu0 %v1974_v0 }
 0x752   :  { %v1300_v38 = vsel %vm531_vm4, %v2001_v5, 0.0  ;;  %v1303_v18 = vpack.c.bf16 %v2001_v5, %v1999_v2  ;;  %v1975_v5 = vld [vmem:[#allocation11 + $0x8] sm:$0xff]  }
 0x753   :  { %v2003_v7 = vpop.eup %2002  ;;  %2012 = vpow2.f32 %v1422_v6  ;;  %1301 = vadd.xlane.f32.xlu1 %v1300_v38  ;;  %1916 = vmatprep.subr.bf16.mxu0 %v1975_v5 }
 0x754   :  { %v926_v34 = vsel %vm531_vm4, %v2003_v7, 0.0 }
 0x755   :  { %v2005_v45 = vpop.eup %2004  ;;  %1917 = vmatpush3.bf16.msra.mxu0 %v1975_v5 }
 0x756   :  { %v923_v9 = vsel %vm531_vm4, %v2005_v45, 0.0  ;;  %v929_v10 = vpack.c.bf16 %v2003_v7, %v2005_v45 }
 0x757   :  { %924 = vadd.xlane.f32.xlu0 %v923_v9  ;;  %927 = vadd.xlane.f32.xlu1 %v926_v34 }
 0x758   :  { %1863 = vmatmul.mubr.msk.bf16.vlgmr.msra.gmra.mrb[32].mxu1 %vm531_vm4, %v929_v10 }
 0x759   :  { %v2007_v11 = vpop.eup %2006  ;;  %1873 = vmatpush3.bf16.msra.mxu1 %v2372_v55  ;;  %1874 = vmatprep.mubr.msk.bf16.mxu1 %vm2194_vm0, %v2193_v26  ;;  %v1178_v55 = vpop.permute.xlu1 %1177 }
 0x75a   :  { %v1424_v43 = vsel %vm531_vm4, %v2007_v11, 0.0  ;;  %1884 = vmatprep.subr.bf16.mxu1 %v2193_v26  ;;  %v2009_v12 = vpop.eup %2008 }
 0x75b   :  { %1425 = vadd.xlane.f32.xlu0 %v1424_v43  ;;  %v2011_v13 = vpop.eup %2010  ;;  %v1050_v17 = vsel %vm531_vm4, %v2009_v12, 0.0 }
 0x75c   :  { %v1053_v1 = vpack.c.bf16 %v2009_v12, %v2011_v13  ;;  %v1047_v56 = vsel %vm531_vm4, %v2011_v13, 0.0  ;;  %v1977_v13 = vld [vmem:[#allocation11 + $0x18] sm:$0xff]  }
 0x75d   :  { %v2013_v62 = vpop.eup %2012 }
 0x75e   :  { %v1427_v61 = vsel %vm531_vm4, %v2013_v62, 0.0  ;;  %v1430_v22 = vpack.c.bf16 %v2013_v62, %v2007_v11  ;;  %v1976_v11 = vld [vmem:[#allocation11 + $0x10] sm:$0xff]  }
 0x75f   :  { %545 = vadd.xlane.f32.xlu0 %v544_v14  ;;  %1428 = vadd.xlane.f32.xlu1 %v1427_v61 }
 0x760   :  { %1875 = vmatmul.mubr.msk.bf16.vlgmr.msra.gmra.mrb[36].mxu1 %vm531_vm4, %v1053_v1  ;;  %1918 = vmatprep.subr.bf16.mxu0 %v1976_v11 }
 0x761   :  { %1885 = vmatpush3.bf16.msra.mxu1 %v1178_v55  ;;  %1886 = vmatprep.mubr.msk.bf16.mxu1 %vm2194_vm0, %v2193_v26 }
 0x762   :  { %1896 = vmatprep.subr.bf16.mxu1 %v2193_v26  ;;  %1919 = vmatpush3.bf16.msra.mxu0 %v1976_v11 }
 0x763   :  { %1048 = vadd.xlane.f32.xlu0 %v1047_v56  ;;  %548 = vadd.xlane.f32.xlu1 %v547_v15 }
 0x764   :  { %1920 = vmatprep.subr.bf16.mxu0 %v1977_v13 }
 0x766   :  { %1921 = vmatpush3.bf16.msra.mxu0 %v1977_v13 }
 0x767   :  { %1051 = vadd.xlane.f32.xlu1 %v1050_v17 }
 0x768   :  { %1887 = vmatmul.mubr.msk.bf16.vlgmr.msra.gmra.mrb[40].mxu1 %vm531_vm4, %v1175_v4  ;;  %v1978_v4 = vld [vmem:[#allocation11 + $0x20] sm:$0xff]  }
 0x769   :  { %1897 = vmatpush3.bf16.msra.mxu1 %v1305_v16  ;;  %1898 = vmatprep.mubr.msk.bf16.mxu1 %vm2194_vm0, %v2193_v26 }
 0x76a   :  { %1908 = vmatprep.subr.bf16.mxu1 %v2193_v26  ;;  %1922 = vmatprep.subr.bf16.mxu0 %v1978_v4 }
 0x76b   :  { %1923 = vmatpush3.bf16.msra.mxu0 %v1978_v4 }
 0x770   :  { %1899 = vmatmul.mubr.msk.bf16.vlgmr.msra.gmra.mrb[44].mxu1 %vm531_vm4, %v1303_v18 }
 0x771   :  { %1909 = vmatpush3.bf16.msra.mxu1 %v1432_v21  ;;  %1910 = vmatprep.mubr.msk.bf16.mxu1 %vm2194_vm0, %v2193_v26  ;;  %v1979_v21 = vld [vmem:[#allocation11 + $0x28] sm:$0xff]  }
 0x772   :  { %1924 = vmatprep.subr.bf16.mxu0 %v1979_v21 }
 0x773   :  { %1925 = vmatpush3.bf16.msra.mxu0 %v1979_v21 }
 0x778   :  { %1911 = vmatmul.mubr.msk.bf16.vlgmr.msra.gmra.mrb[48].mxu1 %vm531_vm4, %v1430_v22 }
 0x781   :  { %v671_v24 = vpop.xlane.xlu0 %670 }
 0x782   :  { %2014 = vrcp.f32 %v671_v24 }
 0x783   :  { %v668_v27 = vpop.xlane.xlu1 %667 }
 0x784   :  { %2016 = vrcp.f32 %v668_v27 }
 0x785   :  { %v797_v48 = vpop.xlane.xlu0 %796 }
 0x786   :  { %2018 = vrcp.f32 %v797_v48 }
 0x787   :  { %v800_v28 = vpop.xlane.xlu1 %799 }
 0x788   :  { %2020 = vrcp.f32 %v800_v28 }
 0x78c   :  { %v2015_v47 = vpop.eup %2014 }
 0x78d   :  { %v724_v31 = vmul.f32 %v2015_v47, %v2440_v58 }
 0x78e   :  { %v2017_v29 = vpop.eup %2016 }
 0x78f   :  { %v723_v30 = vmul.f32 %v2017_v29, %v2438_v54 }
 0x790   :  { %v2019_v19 = vpop.eup %2018 }
 0x791   :  { %v725_v32 = vpack.c.bf16 %v724_v31, %v723_v30  ;;  %v851_v35 = vmul.f32 %v2019_v19, %v2503_v41  ;;  %v1980_v30 = vld [vmem:[#allocation11 + $0x30] sm:$0xff]  }
 0x792   :  { %v2021_v26 = vpop.eup %2020  ;;  %1926 = vmatprep.subr.bf16.mxu0 %v1980_v30 }
 0x793   :  { %727 = vrot.lane.b32.xlu0 %v725_v32, %s2196_s5  ;;  %v852_v20 = vmul.f32 %v2021_v26, %v2506_v46  ;;  %v1981_v32 = vld [vmem:[#allocation11 + $0x38] sm:$0xff]   ;;  %1927 = vmatpush3.bf16.msra.mxu0 %v1980_v30 }
 0x794   :  { %1928 = vmatprep.subr.bf16.mxu0 %v1981_v32 }
 0x795   :  { %v853_v36 = vpack.c.bf16 %v852_v20, %v851_v35 }
 0x797   :  { %855 = vrot.lane.b32.xlu1 %v853_v36, %s2188_s17  ;;  %1929 = vmatpush3.bf16.msra.mxu0 %v1981_v32 }
 0x7d2   :  { %v1171_v33 = vpop.xlane.xlu0 %1170 }
 0x7d4   :  { %v1174_v39 = vpop.xlane.xlu1 %1173 }
 0x7de   :  { %v1299_v37 = vpop.xlane.xlu0 %1298 }
 0x7e0   :  { %v1302_v40 = vpop.xlane.xlu1 %1301 }
 0x7e4   :  { %v925_v42 = vpop.xlane.xlu0 %924  ;;  %v928_v54 = vpop.xlane.xlu1 %927 }
 0x7e8   :  { %v2592_v44 = vpop.xlane.xlu0 %1425 }
 0x7ec   :  { %v2594_v58 = vpop.xlane.xlu1 %1428  ;;  %v546_v49 = vpop.xlane.xlu0 %545 }
 0x7ed   :  { %2022 = vrcp.f32 %v546_v49 }
 0x7f0   :  { %v549_v50 = vpop.xlane.xlu1 %548  ;;  %v1049_v57 = vpop.xlane.xlu0 %1048 }
 0x7f1   :  { %2024 = vrcp.f32 %v549_v50 }
 0x7f2   :  { %2026 = vrcp.f32 %v928_v54 }
 0x7f3   :  { %2028 = vrcp.f32 %v925_v42 }
 0x7f4   :  { %v1052_v59 = vpop.xlane.xlu1 %1051  ;;  %2030 = vrcp.f32 %v1049_v57 }
 0x7f5   :  { %2032 = vrcp.f32 %v1052_v59 }
 0x7f6   :  { %2034 = vrcp.f32 %v1171_v33 }
 0x7f7   :  { %v2023_v41 = vpop.eup %2022  ;;  %2036 = vrcp.f32 %v1174_v39 }
 0x7f8   :  { %v597_v46 = vmul.f32 %v2023_v41, %v2406_v23  ;;  %2038 = vrcp.f32 %v1299_v37 }
 0x7f9   :  { %2040 = vrcp.f32 %v1302_v40 }
 0x7fa   :  { %2042 = vrcp.f32 %v2592_v44 }
 0x7fb   :  { %v2025_v51 = vpop.eup %2024  ;;  %2044 = vrcp.f32 %v2594_v58 }
 0x7fc   :  { %v598_v52 = vmul.f32 %v2025_v51, %v2408_v25  ;;  %v2027_v25 = vpop.eup %2026 }
 0x7fd   :  { %v2029_v3 = vpop.eup %2028 }
 0x7fe   :  { %v599_v53 = vpack.c.bf16 %v598_v52, %v597_v46  ;;  %v2031_v34 = vpop.eup %2030 }
 0x7ff   :  { %v2033_v43 = vpop.eup %2032 }
 0x800   :  { %600 = vst.msk [vmem:[#allocation2] sm:$0xff] %vm483_vm1, %v599_v53  ;;  %v2035_v55 = vpop.eup %2034  ;;  %v1677_v53 = vld [vmem:[%s2632_s7] ss:$0 sm:$0xff] }
 0x801   :  { %v2037_v16 = vpop.eup %2036 }
 0x802   :  { %v2039_v48 = vpop.eup %2038 }
 0x803   :  { %v2041_v31 = vpop.eup %2040 }
 0x804   :  { %v2043_v36 = vpop.eup %2042 }
 0x805   :  { %v728_v60 = vpop.permute.xlu0 %727  ;;  %v2045_v40 = vpop.eup %2044 }
 0x806   :  { %731 = vst.msk [vmem:[#allocation2] sm:$0xff] %vm730_vm5, %v728_v60 }
 0x809   :  { %v856_v63 = vpop.permute.xlu1 %855 }
 0x80a   :  { %859 = vst.msk [vmem:[#allocation2] sm:$0xff] %vm858_vm6, %v856_v63 }
 0x82b   :  { %v970_v23 = vpop.f32.mrb[32].mxu1 }
 0x82c   :  { %v1864_v2 = vpop.f32.mrb[33].mxu1  ;;  %v979_v6 = vmul.f32 %v2029_v3, %v970_v23 }
 0x82d   :  { %v973_v8 = vpop.f32.mrb[34].mxu1 }
 0x82e   :  { %v980_v38 = vmul.f32 %v2027_v25, %v973_v8  ;;  %v1865_v7 = vpop.f32.mrb[35].mxu1 }
 0x830   :  { %v981_v45 = vpack.c.bf16 %v980_v38, %v979_v6 }
 0x832   :  { %983 = vrot.lane.b32.xlu0 %v981_v45, %s2195_s2 }
 0x833   :  { %v1091_v9 = vpop.f32.mrb[36].mxu1 }
 0x834   :  { %v1876_v10 = vpop.f32.mrb[37].mxu1  ;;  %v1100_v62 = vmul.f32 %v2031_v34, %v1091_v9 }
 0x835   :  { %v1094_v12 = vpop.f32.mrb[38].mxu1 }
 0x836   :  { %v1101_v14 = vmul.f32 %v2033_v43, %v1094_v12  ;;  %v1877_v61 = vpop.f32.mrb[39].mxu1 }
 0x838   :  { %v1102_v1 = vpack.c.bf16 %v1101_v14, %v1100_v62 }
 0x83a   :  { %1103 = vst.msk [vmem:[#allocation2 + $0x8] sm:$0xff] %vm483_vm1, %v1102_v1 }
 0x83b   :  { %v1217_v56 = vpop.f32.mrb[40].mxu1 }
 0x83c   :  { %v1226_v15 = vmul.f32 %v2035_v55, %v1217_v56  ;;  %v1888_v17 = vpop.f32.mrb[41].mxu1 }
 0x83d   :  { %v1220_v18 = vpop.f32.mrb[42].mxu1 }
 0x83e   :  { %v1227_v22 = vmul.f32 %v2037_v16, %v1220_v18  ;;  %v1889_v24 = vpop.f32.mrb[43].mxu1 }
 0x840   :  { %v1228_v27 = vpack.c.bf16 %v1227_v22, %v1226_v15 }
 0x842   :  { %1230 = vrot.lane.b32.xlu1 %v1228_v27, %s2196_s5 }
 0x843   :  { %v1344_v28 = vpop.f32.mrb[44].mxu1 }
 0x844   :  { %v1353_v47 = vmul.f32 %v2039_v48, %v1344_v28  ;;  %v1900_v29 = vpop.f32.mrb[45].mxu1 }
 0x845   :  { %v1347_v19 = vpop.f32.mrb[46].mxu1 }
 0x846   :  { %v1354_v26 = vmul.f32 %v2041_v31, %v1347_v19  ;;  %v1901_v35 = vpop.f32.mrb[47].mxu1 }
 0x848   :  { %v1355_v20 = vpack.c.bf16 %v1354_v26, %v1353_v47 }
 0x84a   :  { %1357 = vrot.lane.b32.xlu1 %v1355_v20, %s2188_s17 }
 0x84b   :  { %v1471_v33 = vpop.f32.mrb[48].mxu1 }
 0x84c   :  { %v1480_v39 = vmul.f32 %v2043_v36, %v1471_v33  ;;  %v1912_v37 = vpop.f32.mrb[49].mxu1 }
 0x84d   :  { %v1474_v42 = vpop.f32.mrb[50].mxu1 }
 0x84e   :  { %v1481_v54 = vmul.f32 %v2045_v40, %v1474_v42  ;;  %v1913_v44 = vpop.f32.mrb[51].mxu1 }
 0x850   :  { %v1482_v58 = vpack.c.bf16 %v1481_v54, %v1480_v39 }
 0x852   :  { %1484 = vrot.lane.b32.xlu0 %v1482_v58, %s2195_s2 }
 0x8a4   :  { %v984_v49 = vpop.permute.xlu0 %983 }
 0x8a5   :  { %987 = vst.msk [vmem:[#allocation2] sm:$0xff] %vm986_vm7, %v984_v49 }
 0x8ac   :  { %v1488_v50 = vld [vmem:[#allocation2] sm:$0xff] }
 0x8ad   :  { %1930 = vmatprep.mubr.bf16.mxu0 %v1488_v50 }
 0x8b4   :  { %v1231_v41 = vpop.permute.xlu1 %1230 }
 0x8b5   :  { %1233 = vst.msk [vmem:[#allocation2 + $0x8] sm:$0xff] %vm730_vm5, %v1231_v41 }
 0x8bc   :  { %v1358_v51 = vpop.permute.xlu1 %1357 }
 0x8bd   :  { %1360 = vst.msk [vmem:[#allocation2 + $0x8] sm:$0xff] %vm858_vm6, %v1358_v51 }
 0x8c4   :  { %v1485_v46 = vpop.permute.xlu0 %1484 }
 0x8c5   :  { %1487 = vst.msk [vmem:[#allocation2 + $0x8] sm:$0xff] %vm986_vm7, %v1485_v46 }
 0x8cc   :  { %v1489_v52 = vld [vmem:[#allocation2 + $0x8] sm:$0xff] }
 0x8cd   :  { %1931 = vmatmul.mubr.bf16.vlgmr.msra.gmra.mrb[24].mxu0 %v1489_v52 }
 0x9a0   :  { %v1932_v57 = vpop.f32.mrb[24].mxu0 }
 0x9a1   :  { %v1604_v59 = vadd.f32 %v1932_v57, %v1677_v53  ;;  %v1595_v60 = vpop.f32.mrb[25].mxu0 }
 0x9a2   :  { %v1596_v63 = vadd.f32 %v1677_v53, %v1595_v60  ;;  %v1933_v0 = vpop.f32.mrb[26].mxu0 }
 0x9a3   :  { %1612 = vst [vmem:[#allocation12 + $0x10] sm:$0xff] %v1604_v59  ;;  %v1607_v23 = vadd.f32 %v1933_v0, %v1677_v53  ;;  %v1598_v25 = vpop.f32.mrb[27].mxu0 }
 0x9a4   :  { %1610 = vst [vmem:[#allocation12] sm:$0xff] %v1596_v63  ;;  %v1599_v2 = vadd.f32 %v1677_v53, %v1598_v25 }
 0x9a5   :  { %1613 = vst [vmem:[#allocation12 + $0x18] sm:$0xff] %v1607_v23 }
 0x9a6   :  { %1611 = vst [vmem:[#allocation12 + $0x8] sm:$0xff] %v1599_v2 }
 0x9a7   :  { %2167 = shalt.err (!%p2164_p2)
}
 0x9a8   :  { %s2168_s29 = scalar_lea.hbm %s2633_s8, 512 }
 0x9a9   :  { %p2169_p3 = scmp.ne.s32.totalorder %s2633_s8, %s2168_s29  ;;  %p2172_p4 = scmp.lt.u32.totalorder %s2168_s29, %s2633_s8 }
 0x9ab   :  { %p2174_p5 = pnand %p2172_p4, %p2169_p3 }
 0x9ad   :  { %2177 = shalt.err (!%p2174_p5)
}
 0x9ae   :  { %s2198_s10 = smov 128   ;;  %s2199_s11 = smov 8  }
 0x9af   :  { %1625 = dma.vmem_to_hbm [thread:$0]  %s1620_s25, 512, %s2633_s8, [#allocation5], %s2198_s10, %s2198_s10, %s2199_s11  }
 0x9b0   :  { %2184 = dma.done.wait [#allocation5], 512  }
 0x9b1   :  { %2185 = vsyncadd [#allocation5], 4294966784 }
 0x9b2   :  { %1629 = vsyncpa [#allocation4], 1 }
 0x9b3   :  { %1630 = vsyncpa [#allocation7], 1 }
 0x9b4   :  { %1631 = vsyncpa [#allocation10], 1 }
 0x9b5   :  { %1632 = vsyncpa [#allocation5], 1 }

</bundles_post_ra>
